<compile_context>
chip_gen: v7x
topology: tpu7x:2x2x1
jax: 0.10.0
libtpu: 0.0.40
codegen_flags: <defaults>
</compile_context>

<pallas_src>
import jax
import jax.numpy as jnp
from jax import lax
from jax.experimental import pallas as pl
from jax.experimental.pallas import tpu as pltpu

_HIGH = lax.Precision.HIGHEST


def _build_kernel(C, OUT, OUTP, H, W, PADL):
    HW = H * W
    inv_hw = 1.0 / float(HW)
    BLK1 = 8                                  # conv1 tap block (3 live + 5 zero rows)
    W1_OFF = 8
    W3_OFF = W1_OFF + 9 * BLK1                # = 80

    def kernel(x_ref, wstack_ref, pvec_ref, o_ref, pscr_ref):
        x = x_ref[0]                                          # (C, HW) lane-dense

        # ---- packed tiny parameters (2 operands instead of 13) ----
        mw1 = wstack_ref[0:3, :]                              # (3, C)  MLP layer 1
        w1s = wstack_ref[W1_OFF:W1_OFF + 9 * BLK1, :]         # (72, C) conv1 kn2row stack
        w3s = wstack_ref[W3_OFF:W3_OFF + 9 * OUTP, :]         # (9*OUTP, C)
        c2e = pvec_ref[0:C, 0:8]                              # (C, 8)  1x1 conv, expand folded
        mw2g = pvec_ref[0:C, 8:11]                            # (C, 3)  MLP layer 2 (+ group mean)
        mb2g = pvec_ref[0:C, 11:12]                           # (C, 1)
        mb1 = pvec_ref[0:3, 12:13]                            # (3, 1)
        bn1s = pvec_ref[0:BLK1, 13:14]                        # (8, 1)
        bn1b = pvec_ref[0:BLK1, 14:15]                        # (8, 1)
        bn3s = pvec_ref[0:OUTP, 15:16]                        # (OUTP, 1)
        bn3b = pvec_ref[0:OUTP, 16:17]                        # (OUTP, 1)

        # ---- edge-validity masks, generated in-kernel (no HBM mask stream) ----
        pidx = lax.broadcasted_iota(jnp.int32, (1, HW), 1)
        if (W & (W - 1)) == 0:
            col = pidx & (W - 1)
        else:
            col = pidx % W
        m_l = col >= 1                                        # tap reads column w-1
        m_r = col <= W - 2                                    # tap reads column w+1
        m_t = pidx >= W                                       # tap reads row h-1
        m_b = pidx < HW - W                                   # tap reads row h+1
        vmasks = (m_t, None, m_b)
        hmasks = (m_l, None, m_r)
        tap_masks = []
        for ky in range(3):
            for kx in range(3):
                m = vmasks[ky]
                if hmasks[kx] is not None:
                    m = hmasks[kx] if m is None else (m & hmasks[kx])
                tap_masks.append(m)

        # ---------------- ChannelGate ----------------
        s_sum = jnp.sum(x, axis=1, keepdims=True)             # (C, 1)
        s_max = jnp.max(x, axis=1, keepdims=True)              # (C, 1)

        def mlp1(v):
            return jnp.maximum(
                jnp.dot(mw1, v, preferred_element_type=jnp.float32,
                        precision=_HIGH) + mb1, 0.0)

        h = mlp1(s_sum * inv_hw) + mlp1(s_max)                 # (3, 1)
        logits = jnp.dot(mw2g, h, preferred_element_type=jnp.float32,
                         precision=_HIGH) + mb2g
        ca = jax.nn.sigmoid(logits)                            # (C, 1)
        x_ca = x * ca                                          # (C, HW)

        # ---------------- fused 3x3 conv (kn2row) ----------------
        def conv3x3(z, wstack, blk):
            # one MXU matmul for all 9 taps (stacked along output rows) ...
            p = jnp.dot(wstack, z, preferred_element_type=jnp.float32,
                        precision=_HIGH)                       # (9*blk, HW)
            pscr_ref[0:9 * blk, PADL:PADL + HW] = p            # lane-aligned store
            acc = p[4 * blk:5 * blk]                           # center tap: no shift/mask
            # ... then 8 shifted, edge-masked accumulates.
            for ky in range(3):
                for kx in range(3):
                    if ky == 1 and kx == 1:
                        continue
                    s = ky * 3 + kx
                    d = (ky - 1) * W + (kx - 1)
                    win = pscr_ref[s * blk:(s + 1) * blk, PADL + d:PADL + d + HW]
                    acc = acc + jnp.where(tap_masks[s], win, 0.0)
            return acc                                         # (blk, HW)

        # ---------------- SpatialAtten ----------------
        a1 = conv3x3(x_ca, w1s, BLK1)                          # conv1 3x3 (rows 3..7 = 0)
        t = jnp.maximum(a1 * bn1s + bn1b, 0.0)                 # BN1 + ReLU
        u12 = jnp.dot(c2e, t, preferred_element_type=jnp.float32,
                      precision=_HIGH)                         # 1x1 conv, already 12 rows
        sa12 = jax.nn.sigmoid(jnp.maximum(u12, 0.0))           # (C, HW)
        out0 = jnp.maximum(x_ca * (sa12 + 1.0) + x, 0.0)       # gate combine + residual + ReLU

        # ---------------- conv3 + BN3 + ReLU ----------------
        a3 = conv3x3(out0, w3s, OUTP)
        y = jnp.maximum(a3 * bn3s + bn3b, 0.0)                 # (OUTP, HW)
        o_ref[0, :, :] = y[0:OUT, :]                           # single unmasked lane-dense store

    return kernel


def scale_atten_convblock_forward(x, params):
    """x: (B, 12, H, W) float32. params: dict of module weights (see __main__)."""
    B, C, H, W = x.shape
    assert C == 12, "ChannelGate group-mean assumes 12 channels (3 scales x 4)"
    OUT = params["conv3_w"].shape[0]
    OUTP = ((OUT + 7) // 8) * 8
    HW = H * W
    PADL = ((W + 1 + 127) // 128) * 128        # lane-aligned halo width (>= W+1)
    WROWS = 80 + 9 * OUTP
    PR = max(C, OUTP)
    ROWS = max(72, 9 * OUTP)
    f32 = jnp.float32

    # ---- per-generation VMEM budget (v7x 64MiB -> ~48MiB, v5e/v6e 128MiB -> ~96MiB) ----
    try:
        info = pltpu.get_tpu_info()
        cap = None
        for attr in ("vmem_capacity_bytes", "vmem_size_bytes", "vmem_bytes"):
            cap = getattr(info, attr, None)
            if cap:
                break
        phys_vmem = int(cap) if cap else 128 * 1024 * 1024
    except Exception:
        phys_vmem = 128 * 1024 * 1024
    vmem_limit = min((3 * phys_vmem) // 4, 100 * 1024 * 1024)

    vmem_est = 4 * (
        2 * (C + OUT) * HW                        # double-buffered x / y blocks
        + ROWS * (HW + 2 * PADL)                  # kn2row product scratch
        + (2 * C + 2 * OUTP + ROWS + 64) * HW     # live values / spill headroom
        + 4 * (WROWS + PR) * 128                  # packed parameter slabs (lane padded)
    )
    assert vmem_est < vmem_limit, "feature map too large for the single-block kernel"

    # ---- fold tiny parameters host-side ----
    G = jnp.kron(jnp.eye(3, dtype=f32), jnp.ones((4, 4), f32)) * 0.25   # group mean + expand
    E = jnp.kron(jnp.eye(3, dtype=f32), jnp.ones((4, 1), f32))          # 3 -> 12 row expand

    mw1 = params["mlp_w1"].astype(f32)                                  # (3, 12)
    mb1 = params["mlp_b1"].astype(f32)                                  # (3,)
    mw2g = jnp.dot(G, params["mlp_w2"].astype(f32))                     # (12, 3)
    mb2g = 2.0 * jnp.dot(G, params["mlp_b2"].astype(f32))               # (12,)

    def stack_taps(w, cout, coutp):
        # OIHW -> [tap s = ky*3+kx, cout(padded to coutp), cin]
        taps = jnp.transpose(w.astype(f32), (2, 3, 0, 1)).reshape(9, cout, C)
        buf = jnp.zeros((9, coutp, C), f32).at[:, :cout, :].set(taps)
        return buf.reshape(9 * coutp, C)

    w1s = stack_taps(params["conv1_w"], 3, 8)                           # (72, 12)
    w3s = stack_taps(params["conv3_w"], OUT, OUTP)                      # (9*OUTP, 12)

    wstack = jnp.zeros((WROWS, C), f32)
    wstack = wstack.at[0:3].set(mw1)
    wstack = wstack.at[8:80].set(w1s)
    wstack = wstack.at[80:80 + 9 * OUTP].set(w3s)

    bn1s = (params["bn1_gamma"] / jnp.sqrt(params["bn1_var"] + 1e-5)).astype(f32)
    bn1b = (params["bn1_beta"] - params["bn1_mean"] * bn1s).astype(f32)
    bn3s = (params["bn3_gamma"] / jnp.sqrt(params["bn3_var"] + 1e-5)).astype(f32)
    bn3b = (params["bn3_beta"] - params["bn3_mean"] * bn3s).astype(f32)

    c2e = jnp.dot(E, params["conv2_w"].astype(f32).reshape(3, 3))       # (12, 3)
    c2e8 = jnp.zeros((C, 8), f32).at[:, :3].set(c2e)

    pvec = jnp.zeros((PR, 24), f32)
    pvec = pvec.at[0:C, 0:8].set(c2e8)
    pvec = pvec.at[0:C, 8:11].set(mw2g)
    pvec = pvec.at[0:C, 11].set(mb2g)
    pvec = pvec.at[0:3, 12].set(mb1)
    pvec = pvec.at[0:3, 13].set(bn1s)
    pvec = pvec.at[0:3, 14].set(bn1b)
    pvec = pvec.at[0:OUT, 15].set(bn3s)
    pvec = pvec.at[0:OUT, 16].set(bn3b)

    x_flat = x.astype(f32).reshape(B, C, HW)
    kernel = _build_kernel(C, OUT, OUTP, H, W, PADL)

    out_flat = pl.pallas_call(
        kernel,
        out_shape=jax.ShapeDtypeStruct((B, OUT, HW), f32),
        grid=(B,),
        in_specs=[
            pl.BlockSpec((1, C, HW), lambda b: (b, 0, 0)),
            pl.BlockSpec((WROWS, C), lambda b: (0, 0)),
            pl.BlockSpec((PR, 24), lambda b: (0, 0)),
        ],
        out_specs=pl.BlockSpec((1, OUT, HW), lambda b: (b, 0, 0)),
        scratch_shapes=[pltpu.VMEM((ROWS, HW + 2 * PADL), f32)],
        compiler_params=pltpu.CompilerParams(
            dimension_semantics=("parallel",),
            vmem_limit_bytes=vmem_limit,
        ),
    )(x_flat, wstack, pvec)
    return out_flat.reshape(B, OUT, H, W)


def scale_atten_convblock_reference(x, params):
    """Pure-JAX reference matching the PyTorch forward (eval-mode BN)."""
    B, C, H, W = x.shape

    def mlp(v):
        h = jnp.maximum(v @ params["mlp_w1"].T + params["mlp_b1"], 0.0)
        return h @ params["mlp_w2"].T + params["mlp_b2"]

    avg = jnp.mean(x, axis=(2, 3))
    mx = jnp.max(x, axis=(2, 3))
    cas = mlp(avg) + mlp(mx)                                     # (B, 12)
    gm = jnp.mean(cas.reshape(B, 3, 4), axis=2)                  # (B, 3)
    ca = jax.nn.sigmoid(jnp.repeat(gm, 4, axis=1))               # (B, 12)
    x_ca = x * ca[:, :, None, None]

    dn = ("NCHW", "OIHW", "NCHW")
    t = lax.conv_general_dilated(x_ca, params["conv1_w"], (1, 1), "SAME",
                                 dimension_numbers=dn)
    s1 = params["bn1_gamma"] / jnp.sqrt(params["bn1_var"] + 1e-5)
    b1 = params["bn1_beta"] - params["bn1_mean"] * s1
    t = jnp.maximum(t * s1[None, :, None, None] + b1[None, :, None, None], 0.0)
    u = lax.conv_general_dilated(t, params["conv2_w"], (1, 1), "VALID",
                                 dimension_numbers=dn)
    sa = jax.nn.sigmoid(jnp.maximum(u, 0.0))                     # (B, 3, H, W)
    sa12 = jnp.repeat(sa, 4, axis=1)                             # (B, 12, H, W)

    out0 = jnp.maximum(x_ca * sa12 + x_ca + x, 0.0)
    y = lax.conv_general_dilated(out0, params["conv3_w"], (1, 1), "SAME",
                                 dimension_numbers=dn)
    s3 = params["bn3_gamma"] / jnp.sqrt(params["bn3_var"] + 1e-5)
    b3 = params["bn3_beta"] - params["bn3_mean"] * s3
    return jnp.maximum(y * s3[None, :, None, None] + b3[None, :, None, None], 0.0)


if __name__ == "__main__":
    key = jax.random.PRNGKey(0)
    ks = jax.random.split(key, 16)
    B, C, H, W, OUT = 2, 12, 16, 16, 8

    x = jax.random.normal(ks[0], (B, C, H, W), jnp.float32)
    params = {
        "mlp_w1": 0.3 * jax.random.normal(ks[1], (3, C), jnp.float32),
        "mlp_b1": 0.1 * jax.random.normal(ks[2], (3,), jnp.float32),
        "mlp_w2": 0.3 * jax.random.normal(ks[3], (C, 3), jnp.float32),
        "mlp_b2": 0.1 * jax.random.normal(ks[4], (C,), jnp.float32),
        "conv1_w": 0.2 * jax.random.normal(ks[5], (3, C, 3, 3), jnp.float32),
        "bn1_gamma": 1.0 + 0.1 * jax.random.normal(ks[6], (3,), jnp.float32),
        "bn1_beta": 0.1 * jax.random.normal(ks[7], (3,), jnp.float32),
        "bn1_mean": 0.1 * jax.random.normal(ks[8], (3,), jnp.float32),
        "bn1_var": 0.5 + 0.5 * jnp.abs(jax.random.normal(ks[9], (3,), jnp.float32)),
        "conv2_w": 0.3 * jax.random.normal(ks[10], (3, 3, 1, 1), jnp.float32),
        "conv3_w": 0.2 * jax.random.normal(ks[11], (OUT, C, 3, 3), jnp.float32),
        "bn3_gamma": 1.0 + 0.1 * jax.random.normal(ks[12], (OUT,), jnp.float32),
        "bn3_beta": 0.1 * jax.random.normal(ks[13], (OUT,), jnp.float32),
        "bn3_mean": 0.1 * jax.random.normal(ks[14], (OUT,), jnp.float32),
        "bn3_var": 0.5 + 0.5 * jnp.abs(jax.random.normal(ks[15], (OUT,), jnp.float32)),
    }

    out = jax.jit(scale_atten_convblock_forward)(x, params)
    out = jax.block_until_ready(out)

    with jax.default_matmul_precision("highest"):
        ref = scale_atten_convblock_reference(x, params)
    ref = jax.block_until_ready(ref)

    assert out.shape == (B, OUT, H, W) and out.dtype == jnp.float32
    assert jnp.allclose(out, ref, atol=2e-3, rtol=2e-3), (
        "mismatch vs reference: max abs diff = %e"
        % float(jnp.max(jnp.abs(out - ref))))
    print("KERNEL_OK")
</pallas_src>

<mosaic_0001>
module attributes {stable_mosaic.version = 11 : i64} {
  func.func @kernel(%arg0: i32, %arg1: memref<1x12x256xf32, #tpu.memory_space<vmem>>, %arg2: memref<152x12xf32, #tpu.memory_space<vmem>>, %arg3: memref<12x24xf32, #tpu.memory_space<vmem>>, %arg4: memref<1x8x256xf32, #tpu.memory_space<vmem>>, %arg5: memref<72x512xf32, #tpu.memory_space<vmem>>) attributes {dimension_semantics = [#tpu.dimension_semantics<parallel>], iteration_bounds = array<i64: 2>, scalar_prefetch = 0 : i64, scratch_operands = 1 : i64, tpu.core_type = #tpu.core_type<tc>, window_params = [{transform_indices = @transform_0, window_bounds = array<i64: 1, 12, 256>}, {pipeline_mode = #tpu.pipeline_mode<synchronous>, transform_indices = @transform_1, window_bounds = array<i64: 152, 12>}, {pipeline_mode = #tpu.pipeline_mode<synchronous>, transform_indices = @transform_2, window_bounds = array<i64: 12, 24>}, {transform_indices = @transform_3, window_bounds = array<i64: 1, 8, 256>}]} {
    %c0 = arith.constant 0 : index
    %c0_0 = arith.constant 0 : index
    %c0_1 = arith.constant 0 : index
    %0 = vector.load %arg1[%c0, %c0_0, %c0_1] : memref<1x12x256xf32, #tpu.memory_space<vmem>>, vector<1x12x256xf32>
    %1 = vector.shape_cast %0 : vector<1x12x256xf32> to vector<12x256xf32>
    %c0_2 = arith.constant 0 : index
    %c0_3 = arith.constant 0 : index
    %2 = vector.load %arg2[%c0_2, %c0_3] : memref<152x12xf32, #tpu.memory_space<vmem>>, vector<3x12xf32>
    %c8 = arith.constant 8 : index
    %c0_4 = arith.constant 0 : index
    %3 = vector.load %arg2[%c8, %c0_4] : memref<152x12xf32, #tpu.memory_space<vmem>>, vector<72x12xf32>
    %c80 = arith.constant 80 : index
    %c0_5 = arith.constant 0 : index
    %4 = vector.load %arg2[%c80, %c0_5] : memref<152x12xf32, #tpu.memory_space<vmem>>, vector<72x12xf32>
    %c0_6 = arith.constant 0 : index
    %c0_7 = arith.constant 0 : index
    %5 = vector.load %arg3[%c0_6, %c0_7] : memref<12x24xf32, #tpu.memory_space<vmem>>, vector<12x8xf32>
    %c0_8 = arith.constant 0 : index
    %c8_9 = arith.constant 8 : index
    %6 = vector.load %arg3[%c0_8, %c8_9] : memref<12x24xf32, #tpu.memory_space<vmem>>, vector<12x3xf32>
    %c0_10 = arith.constant 0 : index
    %c11 = arith.constant 11 : index
    %7 = vector.load %arg3[%c0_10, %c11] : memref<12x24xf32, #tpu.memory_space<vmem>>, vector<12x1xf32>
    %c0_11 = arith.constant 0 : index
    %c12 = arith.constant 12 : index
    %8 = vector.load %arg3[%c0_11, %c12] : memref<12x24xf32, #tpu.memory_space<vmem>>, vector<3x1xf32>
    %c0_12 = arith.constant 0 : index
    %c13 = arith.constant 13 : index
    %9 = vector.load %arg3[%c0_12, %c13] : memref<12x24xf32, #tpu.memory_space<vmem>>, vector<8x1xf32>
    %c0_13 = arith.constant 0 : index
    %c14 = arith.constant 14 : index
    %10 = vector.load %arg3[%c0_13, %c14] : memref<12x24xf32, #tpu.memory_space<vmem>>, vector<8x1xf32>
    %c0_14 = arith.constant 0 : index
    %c15 = arith.constant 15 : index
    %11 = vector.load %arg3[%c0_14, %c15] : memref<12x24xf32, #tpu.memory_space<vmem>>, vector<8x1xf32>
    %c0_15 = arith.constant 0 : index
    %c16 = arith.constant 16 : index
    %12 = vector.load %arg3[%c0_15, %c16] : memref<12x24xf32, #tpu.memory_space<vmem>>, vector<8x1xf32>
    %13 = tpu.iota {dimensions = array<i32: 1>} : vector<1x256xi32>
    %c15_i32 = arith.constant 15 : i32
    %14 = vector.broadcast %c15_i32 : i32 to vector<1x256xi32>
    %15 = arith.andi %13, %14 : vector<1x256xi32>
    %c1_i32 = arith.constant 1 : i32
    %16 = vector.broadcast %c1_i32 : i32 to vector<1x256xi32>
    %17 = arith.cmpi sge, %15, %16 : vector<1x256xi32>
    %c14_i32 = arith.constant 14 : i32
    %18 = vector.broadcast %c14_i32 : i32 to vector<1x256xi32>
    %19 = arith.cmpi sle, %15, %18 : vector<1x256xi32>
    %c16_i32 = arith.constant 16 : i32
    %20 = vector.broadcast %c16_i32 : i32 to vector<1x256xi32>
    %21 = arith.cmpi sge, %13, %20 : vector<1x256xi32>
    %c240_i32 = arith.constant 240 : i32
    %22 = vector.broadcast %c240_i32 : i32 to vector<1x256xi32>
    %23 = arith.cmpi slt, %13, %22 : vector<1x256xi32>
    %24 = arith.andi %21, %17 : vector<1x256xi1>
    %25 = arith.andi %21, %19 : vector<1x256xi1>
    %26 = arith.andi %23, %17 : vector<1x256xi1>
    %27 = arith.andi %23, %19 : vector<1x256xi1>
    %cst = arith.constant dense<0.000000e+00> : vector<12xf32>
    %28 = vector.multi_reduction <add>, %1, %cst [1] : vector<12x256xf32> to vector<12xf32>
    %29 = vector.shape_cast %28 : vector<12xf32> to vector<12x1xf32>
    %cst_16 = arith.constant dense<0xFF800000> : vector<12xf32>
    %30 = vector.multi_reduction <maximumf>, %1, %cst_16 [1] : vector<12x256xf32> to vector<12xf32>
    %31 = vector.shape_cast %30 : vector<12xf32> to vector<12x1xf32>
    %cst_17 = arith.constant 3.906250e-03 : f32
    %32 = vector.broadcast %cst_17 : f32 to vector<12x1xf32>
    %33 = arith.mulf %29, %32 : vector<12x1xf32>
    %cst_18 = arith.constant dense<0.000000e+00> : vector<3x1xf32>
    %34 = tpu.matmul %2, %33, %cst_18 {dimension_numbers = #tpu.dot_dimension_numbers<[1], [0], [0], [1], [0, 0, 1, 1], [], []>, precision = #tpu.contract_precision<fp32>} : vector<3x12xf32>, vector<12x1xf32>, vector<3x1xf32> -> vector<3x1xf32>
    %35 = arith.addf %34, %8 : vector<3x1xf32>
    %cst_19 = arith.constant 0.000000e+00 : f32
    %36 = vector.broadcast %cst_19 : f32 to vector<3x1xf32>
    %37 = arith.maximumf %35, %36 : vector<3x1xf32>
    %cst_20 = arith.constant dense<0.000000e+00> : vector<3x1xf32>
    %38 = tpu.matmul %2, %31, %cst_20 {dimension_numbers = #tpu.dot_dimension_numbers<[1], [0], [0], [1], [0, 0, 1, 1], [], []>, precision = #tpu.contract_precision<fp32>} : vector<3x12xf32>, vector<12x1xf32>, vector<3x1xf32> -> vector<3x1xf32>
    %39 = arith.addf %38, %8 : vector<3x1xf32>
    %cst_21 = arith.constant 0.000000e+00 : f32
    %40 = vector.broadcast %cst_21 : f32 to vector<3x1xf32>
    %41 = arith.maximumf %39, %40 : vector<3x1xf32>
    %42 = arith.addf %37, %41 : vector<3x1xf32>
    %cst_22 = arith.constant dense<0.000000e+00> : vector<12x1xf32>
    %43 = tpu.matmul %6, %42, %cst_22 {dimension_numbers = #tpu.dot_dimension_numbers<[1], [0], [0], [1], [0, 0, 1, 1], [], []>, precision = #tpu.contract_precision<fp32>} : vector<12x3xf32>, vector<3x1xf32>, vector<12x1xf32> -> vector<12x1xf32>
    %44 = arith.addf %43, %7 : vector<12x1xf32>
    %45 = arith.negf %44 : vector<12x1xf32>
    %46 = math.exp %45 : vector<12x1xf32>
    %cst_23 = arith.constant 1.000000e+00 : f32
    %47 = vector.broadcast %cst_23 : f32 to vector<12x1xf32>
    %48 = arith.addf %47, %46 : vector<12x1xf32>
    %49 = arith.divf %47, %48 : vector<12x1xf32>
    %50 = vector.broadcast %49 : vector<12x1xf32> to vector<12x256xf32>
    %51 = arith.mulf %1, %50 : vector<12x256xf32>
    %cst_24 = arith.constant dense<0.000000e+00> : vector<72x256xf32>
    %52 = tpu.matmul %3, %51, %cst_24 {dimension_numbers = #tpu.dot_dimension_numbers<[1], [0], [0], [1], [0, 0, 1, 1], [], []>, precision = #tpu.contract_precision<fp32>} : vector<72x12xf32>, vector<12x256xf32>, vector<72x256xf32> -> vector<72x256xf32>
    %c0_25 = arith.constant 0 : index
    %c128 = arith.constant 128 : index
    %53 = vector.load %arg5[%c0_25, %c128] : memref<72x512xf32, #tpu.memory_space<vmem>>, vector<72x256xf32>
    tpu.vector_store %arg5[%c0_25, %c128], %52 {strides = array<i32>} : memref<72x512xf32, #tpu.memory_space<vmem>>, vector<72x256xf32>,
    %54 = vector.extract_strided_slice %52 {offsets = [32, 0], sizes = [8, 256], strides = [1, 1]} : vector<72x256xf32> to vector<8x256xf32>
    %c0_26 = arith.constant 0 : index
    %c111 = arith.constant 111 : index
    %55 = vector.load %arg5[%c0_26, %c111] : memref<72x512xf32, #tpu.memory_space<vmem>>, vector<8x256xf32>
    %cst_27 = arith.constant 0.000000e+00 : f32
    %56 = vector.shape_cast %24 : vector<1x256xi1> to vector<1x256xi1>
    %57 = vector.broadcast %56 : vector<1x256xi1> to vector<8x256xi1>
    %58 = vector.broadcast %cst_27 : f32 to vector<8x256xf32>
    %59 = arith.select %57, %55, %58 : vector<8x256xi1>, vector<8x256xf32>
    %60 = arith.addf %54, %59 : vector<8x256xf32>
    %c8_28 = arith.constant 8 : index
    %c112 = arith.constant 112 : index
    %61 = vector.load %arg5[%c8_28, %c112] : memref<72x512xf32, #tpu.memory_space<vmem>>, vector<8x256xf32>
    %cst_29 = arith.constant 0.000000e+00 : f32
    %62 = vector.shape_cast %21 : vector<1x256xi1> to vector<1x256xi1>
    %63 = vector.broadcast %62 : vector<1x256xi1> to vector<8x256xi1>
    %64 = vector.broadcast %cst_29 : f32 to vector<8x256xf32>
    %65 = arith.select %63, %61, %64 : vector<8x256xi1>, vector<8x256xf32>
    %66 = arith.addf %60, %65 : vector<8x256xf32>
    %c16_30 = arith.constant 16 : index
    %c113 = arith.constant 113 : index
    %67 = vector.load %arg5[%c16_30, %c113] : memref<72x512xf32, #tpu.memory_space<vmem>>, vector<8x256xf32>
    %cst_31 = arith.constant 0.000000e+00 : f32
    %68 = vector.shape_cast %25 : vector<1x256xi1> to vector<1x256xi1>
    %69 = vector.broadcast %68 : vector<1x256xi1> to vector<8x256xi1>
    %70 = vector.broadcast %cst_31 : f32 to vector<8x256xf32>
    %71 = arith.select %69, %67, %70 : vector<8x256xi1>, vector<8x256xf32>
    %72 = arith.addf %66, %71 : vector<8x256xf32>
    %c24 = arith.constant 24 : index
    %c127 = arith.constant 127 : index
    %73 = vector.load %arg5[%c24, %c127] : memref<72x512xf32, #tpu.memory_space<vmem>>, vector<8x256xf32>
    %cst_32 = arith.constant 0.000000e+00 : f32
    %74 = vector.shape_cast %17 : vector<1x256xi1> to vector<1x256xi1>
    %75 = vector.broadcast %74 : vector<1x256xi1> to vector<8x256xi1>
    %76 = vector.broadcast %cst_32 : f32 to vector<8x256xf32>
    %77 = arith.select %75, %73, %76 : vector<8x256xi1>, vector<8x256xf32>
    %78 = arith.addf %72, %77 : vector<8x256xf32>
    %c40 = arith.constant 40 : index
    %c129 = arith.constant 129 : index
    %79 = vector.load %arg5[%c40, %c129] : memref<72x512xf32, #tpu.memory_space<vmem>>, vector<8x256xf32>
    %cst_33 = arith.constant 0.000000e+00 : f32
    %80 = vector.shape_cast %19 : vector<1x256xi1> to vector<1x256xi1>
    %81 = vector.broadcast %80 : vector<1x256xi1> to vector<8x256xi1>
    %82 = vector.broadcast %cst_33 : f32 to vector<8x256xf32>
    %83 = arith.select %81, %79, %82 : vector<8x256xi1>, vector<8x256xf32>
    %84 = arith.addf %78, %83 : vector<8x256xf32>
    %c48 = arith.constant 48 : index
    %c143 = arith.constant 143 : index
    %85 = vector.load %arg5[%c48, %c143] : memref<72x512xf32, #tpu.memory_space<vmem>>, vector<8x256xf32>
    %cst_34 = arith.constant 0.000000e+00 : f32
    %86 = vector.shape_cast %26 : vector<1x256xi1> to vector<1x256xi1>
    %87 = vector.broadcast %86 : vector<1x256xi1> to vector<8x256xi1>
    %88 = vector.broadcast %cst_34 : f32 to vector<8x256xf32>
    %89 = arith.select %87, %85, %88 : vector<8x256xi1>, vector<8x256xf32>
    %90 = arith.addf %84, %89 : vector<8x256xf32>
    %c56 = arith.constant 56 : index
    %c144 = arith.constant 144 : index
    %91 = vector.load %arg5[%c56, %c144] : memref<72x512xf32, #tpu.memory_space<vmem>>, vector<8x256xf32>
    %cst_35 = arith.constant 0.000000e+00 : f32
    %92 = vector.shape_cast %23 : vector<1x256xi1> to vector<1x256xi1>
    %93 = vector.broadcast %92 : vector<1x256xi1> to vector<8x256xi1>
    %94 = vector.broadcast %cst_35 : f32 to vector<8x256xf32>
    %95 = arith.select %93, %91, %94 : vector<8x256xi1>, vector<8x256xf32>
    %96 = arith.addf %90, %95 : vector<8x256xf32>
    %c64 = arith.constant 64 : index
    %c145 = arith.constant 145 : index
    %97 = vector.load %arg5[%c64, %c145] : memref<72x512xf32, #tpu.memory_space<vmem>>, vector<8x256xf32>
    %cst_36 = arith.constant 0.000000e+00 : f32
    %98 = vector.shape_cast %27 : vector<1x256xi1> to vector<1x256xi1>
    %99 = vector.broadcast %98 : vector<1x256xi1> to vector<8x256xi1>
    %100 = vector.broadcast %cst_36 : f32 to vector<8x256xf32>
    %101 = arith.select %99, %97, %100 : vector<8x256xi1>, vector<8x256xf32>
    %102 = arith.addf %96, %101 : vector<8x256xf32>
    %103 = vector.broadcast %9 : vector<8x1xf32> to vector<8x256xf32>
    %104 = arith.mulf %102, %103 : vector<8x256xf32>
    %105 = vector.broadcast %10 : vector<8x1xf32> to vector<8x256xf32>
    %106 = arith.addf %104, %105 : vector<8x256xf32>
    %cst_37 = arith.constant 0.000000e+00 : f32
    %107 = vector.broadcast %cst_37 : f32 to vector<8x256xf32>
    %108 = arith.maximumf %106, %107 : vector<8x256xf32>
    %cst_38 = arith.constant dense<0.000000e+00> : vector<12x256xf32>
    %109 = tpu.matmul %5, %108, %cst_38 {dimension_numbers = #tpu.dot_dimension_numbers<[1], [0], [0], [1], [0, 0, 1, 1], [], []>, precision = #tpu.contract_precision<fp32>} : vector<12x8xf32>, vector<8x256xf32>, vector<12x256xf32> -> vector<12x256xf32>
    %cst_39 = arith.constant 0.000000e+00 : f32
    %110 = vector.broadcast %cst_39 : f32 to vector<12x256xf32>
    %111 = arith.maximumf %109, %110 : vector<12x256xf32>
    %112 = arith.negf %111 : vector<12x256xf32>
    %113 = math.exp %112 : vector<12x256xf32>
    %cst_40 = arith.constant 1.000000e+00 : f32
    %114 = vector.broadcast %cst_40 : f32 to vector<12x256xf32>
    %115 = arith.addf %114, %113 : vector<12x256xf32>
    %116 = arith.divf %114, %115 : vector<12x256xf32>
    %cst_41 = arith.constant 1.000000e+00 : f32
    %117 = vector.broadcast %cst_41 : f32 to vector<12x256xf32>
    %118 = arith.addf %116, %117 : vector<12x256xf32>
    %119 = arith.mulf %51, %118 : vector<12x256xf32>
    %120 = arith.addf %119, %1 : vector<12x256xf32>
    %cst_42 = arith.constant 0.000000e+00 : f32
    %121 = vector.broadcast %cst_42 : f32 to vector<12x256xf32>
    %122 = arith.maximumf %120, %121 : vector<12x256xf32>
    %cst_43 = arith.constant dense<0.000000e+00> : vector<72x256xf32>
    %123 = tpu.matmul %4, %122, %cst_43 {dimension_numbers = #tpu.dot_dimension_numbers<[1], [0], [0], [1], [0, 0, 1, 1], [], []>, precision = #tpu.contract_precision<fp32>} : vector<72x12xf32>, vector<12x256xf32>, vector<72x256xf32> -> vector<72x256xf32>
    %c0_44 = arith.constant 0 : index
    %c128_45 = arith.constant 128 : index
    %124 = vector.load %arg5[%c0_44, %c128_45] : memref<72x512xf32, #tpu.memory_space<vmem>>, vector<72x256xf32>
    tpu.vector_store %arg5[%c0_44, %c128_45], %123 {strides = array<i32>} : memref<72x512xf32, #tpu.memory_space<vmem>>, vector<72x256xf32>,
    %125 = vector.extract_strided_slice %123 {offsets = [32, 0], sizes = [8, 256], strides = [1, 1]} : vector<72x256xf32> to vector<8x256xf32>
    %c0_46 = arith.constant 0 : index
    %c111_47 = arith.constant 111 : index
    %126 = vector.load %arg5[%c0_46, %c111_47] : memref<72x512xf32, #tpu.memory_space<vmem>>, vector<8x256xf32>
    %cst_48 = arith.constant 0.000000e+00 : f32
    %127 = vector.shape_cast %24 : vector<1x256xi1> to vector<1x256xi1>
    %128 = vector.broadcast %127 : vector<1x256xi1> to vector<8x256xi1>
    %129 = vector.broadcast %cst_48 : f32 to vector<8x256xf32>
    %130 = arith.select %128, %126, %129 : vector<8x256xi1>, vector<8x256xf32>
    %131 = arith.addf %125, %130 : vector<8x256xf32>
    %c8_49 = arith.constant 8 : index
    %c112_50 = arith.constant 112 : index
    %132 = vector.load %arg5[%c8_49, %c112_50] : memref<72x512xf32, #tpu.memory_space<vmem>>, vector<8x256xf32>
    %cst_51 = arith.constant 0.000000e+00 : f32
    %133 = vector.shape_cast %21 : vector<1x256xi1> to vector<1x256xi1>
    %134 = vector.broadcast %133 : vector<1x256xi1> to vector<8x256xi1>
    %135 = vector.broadcast %cst_51 : f32 to vector<8x256xf32>
    %136 = arith.select %134, %132, %135 : vector<8x256xi1>, vector<8x256xf32>
    %137 = arith.addf %131, %136 : vector<8x256xf32>
    %c16_52 = arith.constant 16 : index
    %c113_53 = arith.constant 113 : index
    %138 = vector.load %arg5[%c16_52, %c113_53] : memref<72x512xf32, #tpu.memory_space<vmem>>, vector<8x256xf32>
    %cst_54 = arith.constant 0.000000e+00 : f32
    %139 = vector.shape_cast %25 : vector<1x256xi1> to vector<1x256xi1>
    %140 = vector.broadcast %139 : vector<1x256xi1> to vector<8x256xi1>
    %141 = vector.broadcast %cst_54 : f32 to vector<8x256xf32>
    %142 = arith.select %140, %138, %141 : vector<8x256xi1>, vector<8x256xf32>
    %143 = arith.addf %137, %142 : vector<8x256xf32>
    %c24_55 = arith.constant 24 : index
    %c127_56 = arith.constant 127 : index
    %144 = vector.load %arg5[%c24_55, %c127_56] : memref<72x512xf32, #tpu.memory_space<vmem>>, vector<8x256xf32>
    %cst_57 = arith.constant 0.000000e+00 : f32
    %145 = vector.shape_cast %17 : vector<1x256xi1> to vector<1x256xi1>
    %146 = vector.broadcast %145 : vector<1x256xi1> to vector<8x256xi1>
    %147 = vector.broadcast %cst_57 : f32 to vector<8x256xf32>
    %148 = arith.select %146, %144, %147 : vector<8x256xi1>, vector<8x256xf32>
    %149 = arith.addf %143, %148 : vector<8x256xf32>
    %c40_58 = arith.constant 40 : index
    %c129_59 = arith.constant 129 : index
    %150 = vector.load %arg5[%c40_58, %c129_59] : memref<72x512xf32, #tpu.memory_space<vmem>>, vector<8x256xf32>
    %cst_60 = arith.constant 0.000000e+00 : f32
    %151 = vector.shape_cast %19 : vector<1x256xi1> to vector<1x256xi1>
    %152 = vector.broadcast %151 : vector<1x256xi1> to vector<8x256xi1>
    %153 = vector.broadcast %cst_60 : f32 to vector<8x256xf32>
    %154 = arith.select %152, %150, %153 : vector<8x256xi1>, vector<8x256xf32>
    %155 = arith.addf %149, %154 : vector<8x256xf32>
    %c48_61 = arith.constant 48 : index
    %c143_62 = arith.constant 143 : index
    %156 = vector.load %arg5[%c48_61, %c143_62] : memref<72x512xf32, #tpu.memory_space<vmem>>, vector<8x256xf32>
    %cst_63 = arith.constant 0.000000e+00 : f32
    %157 = vector.shape_cast %26 : vector<1x256xi1> to vector<1x256xi1>
    %158 = vector.broadcast %157 : vector<1x256xi1> to vector<8x256xi1>
    %159 = vector.broadcast %cst_63 : f32 to vector<8x256xf32>
    %160 = arith.select %158, %156, %159 : vector<8x256xi1>, vector<8x256xf32>
    %161 = arith.addf %155, %160 : vector<8x256xf32>
    %c56_64 = arith.constant 56 : index
    %c144_65 = arith.constant 144 : index
    %162 = vector.load %arg5[%c56_64, %c144_65] : memref<72x512xf32, #tpu.memory_space<vmem>>, vector<8x256xf32>
    %cst_66 = arith.constant 0.000000e+00 : f32
    %163 = vector.shape_cast %23 : vector<1x256xi1> to vector<1x256xi1>
    %164 = vector.broadcast %163 : vector<1x256xi1> to vector<8x256xi1>
    %165 = vector.broadcast %cst_66 : f32 to vector<8x256xf32>
    %166 = arith.select %164, %162, %165 : vector<8x256xi1>, vector<8x256xf32>
    %167 = arith.addf %161, %166 : vector<8x256xf32>
    %c64_67 = arith.constant 64 : index
    %c145_68 = arith.constant 145 : index
    %168 = vector.load %arg5[%c64_67, %c145_68] : memref<72x512xf32, #tpu.memory_space<vmem>>, vector<8x256xf32>
    %cst_69 = arith.constant 0.000000e+00 : f32
    %169 = vector.shape_cast %27 : vector<1x256xi1> to vector<1x256xi1>
    %170 = vector.broadcast %169 : vector<1x256xi1> to vector<8x256xi1>
    %171 = vector.broadcast %cst_69 : f32 to vector<8x256xf32>
    %172 = arith.select %170, %168, %171 : vector<8x256xi1>, vector<8x256xf32>
    %173 = arith.addf %167, %172 : vector<8x256xf32>
    %174 = vector.broadcast %11 : vector<8x1xf32> to vector<8x256xf32>
    %175 = arith.mulf %173, %174 : vector<8x256xf32>
    %176 = vector.broadcast %12 : vector<8x1xf32> to vector<8x256xf32>
    %177 = arith.addf %175, %176 : vector<8x256xf32>
    %cst_70 = arith.constant 0.000000e+00 : f32
    %178 = vector.broadcast %cst_70 : f32 to vector<8x256xf32>
    %179 = arith.maximumf %177, %178 : vector<8x256xf32>
    %c0_71 = arith.constant 0 : index
    %c0_72 = arith.constant 0 : index
    %c0_73 = arith.constant 0 : index
    %180 = vector.load %arg4[%c0_71, %c0_72, %c0_73] : memref<1x8x256xf32, #tpu.memory_space<vmem>>, vector<1x8x256xf32>
    %181 = vector.shape_cast %180 : vector<1x8x256xf32> to vector<8x256xf32>
    %182 = vector.shape_cast %179 : vector<8x256xf32> to vector<1x8x256xf32>
    tpu.vector_store %arg4[%c0_71, %c0_72, %c0_73], %182 {strides = array<i32>} : memref<1x8x256xf32, #tpu.memory_space<vmem>>, vector<1x8x256xf32>,
    return
  }
  func.func @transform_0(%arg0: i32) -> (i32, i32, i32) {
    %c0_i32 = arith.constant 0 : i32
    %c0_i32_0 = arith.constant 0 : i32
    %c0_i32_1 = arith.constant 0 : i32
    return %arg0, %c0_i32, %c0_i32_0 : i32, i32, i32
  }
  func.func @transform_1(%arg0: i32) -> (i32, i32) {
    %c0_i32 = arith.constant 0 : i32
    %c0_i32_0 = arith.constant 0 : i32
    %c0_i32_1 = arith.constant 0 : i32
    return %c0_i32, %c0_i32_0 : i32, i32
  }
  func.func @transform_2(%arg0: i32) -> (i32, i32) {
    %c0_i32 = arith.constant 0 : i32
    %c0_i32_0 = arith.constant 0 : i32
    %c0_i32_1 = arith.constant 0 : i32
    return %c0_i32, %c0_i32_0 : i32, i32
  }
  func.func @transform_3(%arg0: i32) -> (i32, i32, i32) {
    %c0_i32 = arith.constant 0 : i32
    %c0_i32_0 = arith.constant 0 : i32
    %c0_i32_1 = arith.constant 0 : i32
    return %arg0, %c0_i32, %c0_i32_0 : i32, i32, i32
  }
}

</mosaic_0001>

<bundles_post_ra>
// kernel: scale_atten_convblock_forward.1
= control target key start
LH: loop header
LB: loop body
LE: loop exit
PB: predicated region body
PF: predicated region fallthrough
CT: control target
= control target key end

     0   :  { %8 = vsyncpa [#allocation4], 0  ;;  %s6560_s0 = inlined_call_operand.hbm [shape: f32[2,12,256], index: 0, kind: input, shape index: {}]   ;;  %s6561_s1 = inlined_call_operand.hbm [shape: f32[152,12], index: 1, kind: input, shape index: {}]   ;;  %s6562_s2 = inlined_call_operand.hbm [shape: f32[12,24], index: 2, kind: input, shape index: {}]   ;;  %s6563_s3 = inlined_call_operand.hbm [shape: f32[2,8,256], index: 3, kind: output, shape index: {}]  }
   0x1   :  { %10 = vsyncpa [#allocation4 + $0x1], 0 }
   0x2   :  { %11 = vsyncpa [#allocation7], 0 }
   0x3   :  { %12 = vsyncpa [#allocation5], 0 }
   0x4   :  { %14 = vsyncpa [#allocation5 + $0x1], 0  ;;  %s5524_s12 = smov 0   ;;  %s5526_s13 = smov 0  }
   0x5   :  { %s5528_s14 = smov 0   ;;  %s5530_s15 = smov 0  }
   0x6 LB: > { %s5545_s16 = sadd.s32 4294967295, %s5475_s15   ;;  %s4680_s17 = sadd.s32 4294967294, %s5475_s15   ;;  %s5475_s15 = sphi %s5530_s15, %s6611_s15   ;;  %s5471_s14 = sphi %s5528_s14, %s6610_s14   ;;  %s5467_s13 = sphi %s5526_s13, %s6609_s13   ;;  %s5463_s12 = sphi %s5524_s12, %s6608_s12  }
   0x7   : > { %p40_p0 = scmp.ne.s32.totalorder %s5467_s13, %s5463_s12  ;;  %p6564_p1 = scmp.eq.s32.totalorder %s5545_s16, 0 }
   0x8   : > { %p112_p3 = scmp.eq.s32.totalorder %s4680_s17, 1  ;;  %p4681_p5 = scmp.ge.s32.totalorder %s5475_s15, 1 }
   0x9   : > { %p5554_p4 = por %p6564_p1, %p40_p0  ;;  %p119_p7 = scmp.lt.s32.totalorder %s5475_s15, 3 }
   0xa   : > { %p5559_p6 = por %p112_p3, %p40_p0  ;;  %s5477_s21 = smov [#allocation6]  }
   0xb   : > { %s6572_s18 = scalar_select %p5554_p4, 1, 0 }
   0xc   : > { %s6573_s19 = scalar_select %p5559_p6, 1, 0 }
   0xd   : > { %p5564_p8 = pnand %p4681_p5, %p119_p7  ;;  %s131_s22 = sshll.u32 %s5477_s21, 4  ;;  %s5568_s22 = int_to_ptr.vmem [resolvable:$true] %s131_s22 }
   0xe   : > { %s5478_s24 = smov [#allocation8]   ;;  %s5319_s28 = scalar_lea.hbm %s6561_s1, 2432 }
   0xf   : > { %p5204_p9 = pneg %p5564_p8  ;;  %s144_s25 = sshll.u32 %s5478_s24, 4  ;;  %s5579_s25 = int_to_ptr.vmem [resolvable:$true] %s144_s25 }
  0x10   : > { %p5320_p12 = scmp.ne.s32.totalorder %s6561_s1, %s5319_s28  ;;  %p5326_p5 = scmp.lt.u32.totalorder %s5319_s28, %s6561_s1 }
  0x11   : > { %p5575_p11 = pnand %p5204_p9, %p6564_p1 }
  0x13   : > { %p5321_p13 = pneg %p5575_p11 }
  0x15   : > { %p5322_p0 = pnand %p5321_p13, %p5320_p12 }
  0x17   : > { %p5323_p3 = pneg %p5322_p0 }
  0x19   : > { %p5328_p7 = pnand %p5326_p5, %p5323_p3 }
  0x1b   : > { %5331 = shalt.err (!%p5328_p7)
}
  0x1c   : > { %s5332_s6 = scalar_lea.vmem %s5568_s22, 2432  ;;  %p5340_p2 = scmp.lt.s32.totalorder %s5568_s22, %s5568_s22 }
  0x1d   : > { %p5333_p9 = scmp.ne.s32.totalorder %s5568_s22, %s5332_s6  ;;  %p5341_p12 = scmp.lt.s32.totalorder %s5332_s6, %s5332_s6 }
  0x1f   : > { %p5335_p10 = pnand %p5333_p9, %p5321_p13  ;;  %p5342_p0 = por %p5341_p12, %p5340_p2 }
  0x21   : > { %p5336_p1 = pneg %p5335_p10 }
  0x23   : > { %p5343_p6 = pnand %p5342_p0, %p5336_p1 }
  0x25   : > { %5346 = shalt.err (!%p5343_p6)
}
  0x26   : > { %s5479_s7 = smov 128   ;;  %s5480_s8 = smov 8  }
  0x27   : > { %5207 = dma.hbm_to_vmem [thread:$0]  (!%p5575_p11), %s6561_s1, 2432, %s5568_s22, [#allocation7], %s5479_s7, %s5479_s7, %s5480_s8  }
  0x28   : > { %s5347_s21 = scalar_lea.hbm %s6562_s2, 256 }
  0x29   : > { %p5348_p2 = scmp.ne.s32.totalorder %s6562_s2, %s5347_s21  ;;  %p5354_p10 = scmp.lt.u32.totalorder %s5347_s21, %s6562_s2 }
  0x2b   : > { %p5350_p1 = pnand %p5348_p2, %p5321_p13 }
  0x2d   : > { %p5351_p6 = pneg %p5350_p1 }
  0x2f   : > { %p5356_p3 = pnand %p5354_p10, %p5351_p6 }
  0x31   : > { %5359 = shalt.err (!%p5356_p3)
}
  0x32   : > { %s5360_s22 = scalar_lea.vmem %s5579_s25, 256  ;;  %p5368_p12 = scmp.lt.s32.totalorder %s5579_s25, %s5579_s25 }
  0x33   : > { %p5361_p5 = scmp.ne.s32.totalorder %s5579_s25, %s5360_s22  ;;  %p5369_p0 = scmp.lt.s32.totalorder %s5360_s22, %s5360_s22 }
  0x35   : > { %p5363_p7 = pnand %p5361_p5, %p5321_p13  ;;  %p5370_p2 = por %p5369_p0, %p5368_p12 }
  0x37   : > { %p5364_p9 = pneg %p5363_p7 }
  0x39   : > { %p5371_p1 = pnand %p5370_p2, %p5364_p9 }
  0x3b   : > { %5374 = shalt.err (!%p5371_p1)
}
  0x3c   : > { %5210 = dma.hbm_to_vmem [thread:$0]  (!%p5575_p11), %s6562_s2, 256, %s5579_s25, [#allocation7], %s5479_s7, %s5479_s7, %s5480_s8  }
  0x3d   : > { %s5634_s4 = sadd.s32 1, %s5475_s15   ;;  %s27_s23 = sadd.s32 1, %s5471_s14 }
  0x3e   : > { %s24_s5 = ssub.s32 %s5475_s15, %s5634_s4  ;;  %p34_p13 = scmp.ne.s32.totalorder %s5471_s14, %s5467_s13 }
  0x3f   : > { %p25_p6 = scmp.eq.s32.totalorder %s24_s5, 0  ;;  %p35_p10 = scmp.eq.s32.totalorder %s5475_s15, 0 }
  0x40   : > { %p6576_p3 = scmp.eq.s32.totalorder %s5545_s16, 1  ;;  %p5221_p7 = scmp.lt.s32.totalorder %s5475_s15, 2 }
  0x41   : > { %s5650_s9 = scalar_select %p25_p6, %s5471_s14, %s27_s23  }
  0x42   : > { %p5644_p5 = por %p6576_p3, %p34_p13  ;;  %p36_p9 = por %p35_p10, %p34_p13 }
  0x43   : > { %s158_s10 = sand.u32 1, %s5471_s14   ;;  %s4704_s25 = sshll.u32 %s5475_s15, 9 }
  0x44   : > { %s6577_s6 = scalar_select %p5644_p5, 1, 0 }
  0x45   : > { %s4685_s11 = sshll.u32 %s158_s10, 5  ;;  %s5657_s17 = scalar_lea.hbm %s6560_s0, %s4704_s25 }
  0x46   : > { %s162_s21 = scalar_lea.vmem [#allocation3], %s4685_s11  ;;  %p5661_p11 = pnand %p5221_p7, %p36_p9 }
  0x47   : > { %s169_s24 = sshll.u32 %s162_s21, 4  ;;  %s5665_s27 = scalar_lea.sflag [#allocation4], %s158_s10  ;;  %s5659_s24 = int_to_ptr.vmem [resolvable:$true] %s169_s24 }
  0x48   : > { %s5375_s28 = scalar_lea.hbm %s5657_s17, 512  ;;  %p5377_p0 = pneg %p5661_p11 }
  0x49   : > { %p5376_p12 = scmp.ne.s32.totalorder %s5657_s17, %s5375_s28  ;;  %s5380_s30 = scalar_lea.hbm %s6560_s0, 1024 }
  0x4a   : > { %p5381_p13 = scmp.lt.u32.totalorder %s5657_s17, %s6560_s0  ;;  %p5382_p6 = scmp.lt.u32.totalorder %s5380_s30, %s5375_s28 }
  0x4b   : > { %p5378_p2 = pnand %p5377_p0, %p5376_p12  ;;  %p5384_p3 = scmp.lt.u32.totalorder %s5375_s28, %s5657_s17 }
  0x4c   : > { %p5383_p10 = por %p5382_p6, %p5381_p13 }
  0x4d   : > { %p5379_p1 = pneg %p5378_p2 }
  0x4e   : > { %p5385_p7 = por %p5384_p3, %p5383_p10 }
  0x50   : > { %p5386_p9 = pnand %p5385_p7, %p5379_p1 }
  0x52   : > { %5389 = shalt.err (!%p5386_p9)
}
  0x53   : > { %s5390_s10 = scalar_lea.vmem %s5659_s24, 512  ;;  %s5481_s11 = smov [#allocation3]  }
  0x54   : > { %p5391_p12 = scmp.ne.s32.totalorder %s5659_s24, %s5390_s10  ;;  %s5395_s25 = sshll.u32 %s5481_s11, 4  ;;  %s5396_s25 = int_to_ptr.vmem [resolvable:$false] %s5395_s25 }
  0x55   : > { %s5397_s7 = scalar_lea.vmem %s5396_s25, 1024  ;;  %p5398_p4 = scmp.lt.s32.totalorder %s5659_s24, %s5396_s25 }
  0x56   : > { %p5393_p2 = pnand %p5391_p12, %p5377_p0  ;;  %p5399_p13 = scmp.lt.s32.totalorder %s5397_s7, %s5390_s10 }
  0x58   : > { %p5394_p5 = pneg %p5393_p2  ;;  %p5400_p6 = por %p5399_p13, %p5398_p4 }
  0x5a   : > { %p5401_p10 = pnand %p5400_p6, %p5394_p5 }
  0x5c   : > { %5404 = shalt.err (!%p5401_p10)
}
  0x5d   : > { %s5482_s8 = smov 256   ;;  %s5483_s21 = smov 16  }
  0x5e   : > { %5214 = dma.hbm_to_vmem [thread:$0]  (!%p5661_p11), %s5657_s17, 512, %s5659_s24, %s5665_s27, %s5482_s8, %s5482_s8, %s5483_s21  }
  0x5f   : > { %181 = sbr.rel (%p5564_p8) target bundleno = 2357 (0x935), region = 32  ;;  %s5696_s28 = sand.u32 (!%p5564_p8), 1, %s5467_s13  }
  0x60   : > { %s4689_s22 = sshll.u32 (!%p5564_p8), %s5696_s28, 5  ;;  %s184_s29 = scalar_lea.sflag (!%p5564_p8), [#allocation4], %s5696_s28 }
  0x61   : > { %s5700_s30 = scalar_lea.vmem (!%p5564_p8), [#allocation3], %s4689_s22  ;;  %p6579_p4 = scmp.ne.s32.totalorder (!%p5564_p8), %s6572_s18, 0 }
  0x66   : > { %5450 = dma.done.wait (%p6579_p4), %s184_s29, 512  }
  0x67   : > { %5452 = vsyncadd (%p6579_p4), %s184_s29, 4294966784  ;;  %p6580_p5 = scmp.eq.s32.totalorder %s5545_s16, 0 }
  0x69   : > { %5454 = dma.done.wait (%p6580_p5), [#allocation7], 2688   ;;  %p6581_p8 = pmov %p6580_p5 }
  0x6a   : > { %vm268_vm0 = vcmask 1043456   ;;  %v5711_v0 = vld [vmem:[%s5700_s30 + $0x10] sm:$0xf]  ;;  %v5714_v1 = vld [vmem:[%s5700_s30 + $0x18] sm:$0xf]  ;;  %v5725_v6 = vld [vmem:[%s5700_s30] sm:$0xff] }
  0x6b   : > { %5456 = vsyncadd (%p6581_p8), [#allocation7], 4294964608  ;;  %v277_v2 = vsel %vm268_vm0, %v5711_v0, -inf  ;;  %v278_v3 = vsel %vm268_vm0, %v5714_v1, -inf  ;;  %v269_v4 = vsel %vm268_vm0, %v5711_v0, 0.0  ;;  %v270_v5 = vsel %vm268_vm0, %v5714_v1, 0.0 }
  0x6c   : > { %v5728_v7 = vld [vmem:[%s5700_s30 + $0x8] sm:$0xff]  ;;  %v279_v8 = vmax.f32 %v277_v2, %v278_v3  ;;  %v271_v9 = vadd.f32 %v270_v5, %v269_v4  ;;  %v5484_v12 = vmov 0.0|0.0   ;;  %vm5485_vm1 = vmmov 0   ;;  %v243_v14 = vld [vmem:[#allocation8] sm:$0x7]  ;;  %s5487_s18 = smov 116  }
  0x6d   : > { %v274_v10 = vmax.f32 %v5725_v6, %v5728_v7  ;;  %v265_v11 = vadd.f32 %v5728_v7, %v5725_v6  ;;  %4892 = vmatprep.subr.bf16.mxu1 %v5484_v12  ;;  %4874 = vmatprep.subr.bf16.mxu0 %v5484_v12  ;;  %v5486_v13 = vmov 0.0   ;;  %v5740_v15 = vld [vmem:[#allocation8] sm:$0xff]  ;;  %s5488_s20 = smov 120   ;;  %v5743_v16 = vld [vmem:[#allocation8 + $0x8] sm:$0xf]  ;;  %vm288_vm2 = vcmask 97280  }
  0x6e   : > { %280 = vmax.xlane.f32.xlu1 %v279_v8  ;;  %272 = vadd.xlane.f32.xlu0 %v271_v9  ;;  %v222_v17 = vld [vmem:[#allocation6] sm:$0x7]  ;;  %vm1231_vm3 = vcmask 23552   ;;  %s5489_s17 = smov 117   ;;  %vm1236_vm4 = vcmask 1042432   ;;  %s5491_s24 = smov 17  }
  0x6f   : > { %4806 = vmatprep.mubr.msk.f32.mxu1 %vm5485_vm1, %v5486_v13  ;;  %4764 = vmatprep.mubr.msk.f32.mxu0 %vm5485_vm1, %v5486_v13  ;;  %v290_v18 = vsel %vm288_vm2, %v222_v17, 0  ;;  %s5492_s26 = smov 16   ;;  %s5494_s27 = smov 15   ;;  %vm2705_vm7 = vcmask 138240   ;;  %vm2730_vm9 = vcmask 130048   ;;  %vm6569_vm12 = vcmask 121856  }
  0x70   : > { %v5747_v19 = vand.u32 4294901760, %v290_v18  ;;  %s5495_s23 = smov 1   ;;  %s5496_s5 = smov 113   ;;  %vm6568_vm13 = vcmask 7168  }
  0x71   : > { %s5497_s10 = smov 127   ;;  %s5498_s11 = smov 112  }
  0x72   : > { %275 = vmax.xlane.f32.xlu1 %v274_v10  ;;  %266 = vadd.xlane.f32.xlu0 %v265_v11  ;;  %v363_v20 = vsub.f32 %v290_v18, %v5747_v19  ;;  %s5500_s25 = smov 111   ;;  %s4692_s7 = sshll.u32 %s5696_s28, 4 }
  0x73   : > { %s4705_s8 = sshll.u32 %s5545_s16, 8  ;;  %s217_s21 = scalar_lea.vmem [#allocation9], %s4692_s7 }
  0x74   : > { %v5750_v23 = vand.u32 4294901760, %v363_v20  ;;  %s4591_s22 = sshll.u32 %s217_s21, 4  ;;  %p6605_p0 = scmp.ne.s32.totalorder %s6577_s6, 0  ;;  %s6518_s22 = int_to_ptr.vmem [resolvable:$true] %s4591_s22 }
  0x75   : > { %s5503_s16 = smov [#allocation9]  }
  0x76   : > { %v365_v32 = vsub.f32 %v363_v20, %v5750_v23 }
  0x78   : > { %v366_v41 = vand.u32 4294901760, %v365_v32  ;;  %v5490_v32 = vmov 0  }
  0x79   : > { %5282 = vset.pattern.permute.xlu1 %v5490_v32  ;;  %5283 = vset.pattern.permute.xlu0 %v5490_v32 }
  0x83   : > { %285 = vrot.lane.b32.xlu1 %v243_v14, %s5487_s18  ;;  %s6516_s18 = scalar_lea.hbm %s6563_s3, %s4705_s8 }
  0x87   : > { %1223 = vrot.lane.b32.xlu1 %v5743_v16, %s5488_s20 }
  0x88   : > { %1221 = vrot.lane.b32.xlu0 %v5740_v15, %s5488_s20  ;;  %s4577_s20 = scalar_lea.sflag [#allocation5], %s5696_s28 }
  0x8b   : > { %1227 = vrot.lane.b32.xlu1 %v5743_v16, %s5489_s17 }
  0x8c   : > { %1225 = vrot.lane.b32.xlu0 %v5740_v15, %s5489_s17  ;;  %s5405_s17 = scalar_lea.vmem %s6518_s22, 256 }
  0x8d   : > { %p5406_p11 = scmp.ne.s32.totalorder %s6518_s22, %s5405_s17 }
  0x8f   : > { %p5407_p1 = pnand %p5406_p11, %p6605_p0 }
  0x91   : > { %p5408_p3 = pneg %p5407_p1 }
  0xfb   : > { %v281_v21 = vpop.xlane.xlu1 %280  ;;  %v273_v22 = vpop.xlane.xlu0 %272 }
  0xfc   : > { %v756_v24 = vsel %vm268_vm0, %v281_v21, 0  ;;  %v283_v25 = vmul.f32 0.00390625, %v273_v22 }
  0xfd   : > { %v762_v26 = vand.u32 4294901760, %v756_v24 }
  0xfe   : > { %v293_v27 = vsel %vm268_vm0, %v283_v25, 0 }
  0xff   : > { %v844_v28 = vsub.f32 %v756_v24, %v762_v26  ;;  %v299_v29 = vand.u32 4294901760, %v293_v27  ;;  %v276_v30 = vpop.xlane.xlu1 %275  ;;  %v267_v31 = vpop.xlane.xlu0 %266 }
 0x100   : > { %v759_v33 = vand.u32 4294901760, %v276_v30  ;;  %v282_v34 = vmul.f32 0.00390625, %v267_v31 }
 0x101   : > { %v845_v35 = vand.u32 4294901760, %v844_v28  ;;  %v381_v36 = vsub.f32 %v293_v27, %v299_v29 }
 0x102   : > { %v4893_v37 = vpack.c.bf16 %v762_v26, %v759_v33  ;;  %v837_v38 = vsub.f32 %v276_v30, %v759_v33  ;;  %v296_v39 = vand.u32 4294901760, %v282_v34 }
 0x103   : > { %v382_v40 = vand.u32 4294901760, %v381_v36  ;;  %v846_v42 = vsub.f32 %v844_v28, %v845_v35  ;;  %v1222_v60 = vpop.permute.xlu0 %1221  ;;  %v286_v5 = vpop.permute.xlu1 %285 }
 0x104   : > { %v838_v43 = vand.u32 4294901760, %v837_v38  ;;  %v374_v44 = vsub.f32 %v282_v34, %v296_v39  ;;  %4894 = vmatpush3.bf16.msra.mxu1 %v4893_v37  ;;  %v4875_v45 = vpack.c.bf16 %v299_v29, %v296_v39  ;;  %v4899_v56 = vpack.c.bf16 %v844_v28, %v837_v38 }
 0x105   : > { %4895 = vmatprep.subr.bf16.mxu1 %v5484_v12  ;;  %v383_v46 = vsub.f32 %v381_v36, %v382_v40  ;;  %v847_v49 = vand.u32 4294901760, %v846_v42  ;;  %v1232_v61 = vsel %vm1231_vm3, %v1222_v60, 0 }
 0x106   : > { %v839_v47 = vsub.f32 %v837_v38, %v838_v43  ;;  %v375_v48 = vand.u32 4294901760, %v374_v44  ;;  %4876 = vmatpush3.bf16.msra.mxu0 %v4875_v45  ;;  %v4881_v57 = vpack.c.bf16 %v381_v36, %v374_v44  ;;  %v4905_v58 = vpack.c.bf16 %v845_v35, %v838_v43 }
 0x107   : > { %4807 = vmatmul.mubr.f32.vlgmr.msra.gmra.mrb[0].mxu1 %v366_v41  ;;  %4877 = vmatprep.subr.bf16.mxu0 %v5484_v12  ;;  %v384_v52 = vand.u32 4294901760, %v383_v46  ;;  %v1306_v62 = vand.u32 4294901760, %v1232_v61  ;;  %v1224_v8 = vpop.permute.xlu1 %1223  ;;  %v1226_v34 = vpop.permute.xlu0 %1225 }
 0x108   : > { %v840_v50 = vand.u32 4294901760, %v839_v47  ;;  %v376_v51 = vsub.f32 %v374_v44, %v375_v48  ;;  %4813 = vmatprep.mubr.msk.f32.mxu1 %vm5485_vm1, %v5486_v13  ;;  %v4887_v59 = vpack.c.bf16 %v382_v40, %v375_v48  ;;  %v1234_v9 = vsel %vm1231_vm3, %v1224_v8, 0  ;;  %v223_v47 = vld [vmem:[#allocation6 + $0x8] sm:$0xff] }
 0x109   : > { %4765 = vmatmul.mubr.f32.vlgmr.msra.gmra.mrb[0].mxu0 %v366_v41  ;;  %v1307_v63 = vsub.f32 %v1232_v61, %v1306_v62  ;;  %v1316_v10 = vand.u32 4294901760, %v1234_v9  ;;  %v1756_v48 = vsel %vm288_vm2, %v223_v47, 0  ;;  %vm2903_vm3 = vcmask 64512  }
 0x10a   : > { %v377_v53 = vand.u32 4294901760, %v376_v51  ;;  %v4896_v54 = vpack.c.bf16 %v847_v49, %v840_v50  ;;  %4771 = vmatprep.mubr.msk.f32.mxu0 %vm5485_vm1, %v5486_v13  ;;  %v224_v49 = vld [vmem:[#allocation6 + $0x10] sm:$0xff]  ;;  %v5798_v50 = vand.u32 4294901760, %v1756_v48 }
 0x10b   : > { %v1308_v2 = vand.u32 4294901760, %v1307_v63  ;;  %v1317_v11 = vsub.f32 %v1234_v9, %v1316_v10  ;;  %v1228_v33 = vpop.permute.xlu1 %1227  ;;  %v1759_v51 = vsel %vm288_vm2, %v224_v49, 0 }
 0x10c   : > { %4897 = vmatpush3.bf16.msra.mxu1 %v4896_v54  ;;  %v4878_v55 = vpack.c.bf16 %v384_v52, %v377_v53  ;;  %v225_v52 = vld [vmem:[#allocation6 + $0x18] sm:$0xff]  ;;  %v5801_v53 = vand.u32 4294901760, %v1759_v51  ;;  %v5804_v54 = vsub.f32 %v1756_v48, %v5798_v50 }
 0x10d   : > { %4898 = vmatprep.subr.bf16.mxu1 %v5484_v12  ;;  %v1309_v3 = vsub.f32 %v1307_v63, %v1308_v2  ;;  %v1318_v21 = vand.u32 4294901760, %v1317_v11 }
 0x10e   : > { %4879 = vmatpush3.bf16.msra.mxu0 %v4878_v55  ;;  %v1762_v55 = vsel %vm288_vm2, %v225_v52, 0 }
 0x10f   : > { %4814 = vmatmul.mubr.f32.vlgmr.msra.gmra.mrb[0].mxu1 %v5747_v19  ;;  %4880 = vmatprep.subr.bf16.mxu0 %v5484_v12  ;;  %v1310_v4 = vand.u32 4294901760, %v1309_v3  ;;  %v1319_v25 = vsub.f32 %v1317_v11, %v1318_v21 }
 0x110   : > { %4900 = vmatpush3.bf16.msra.mxu1 %v4899_v56  ;;  %4820 = vmatprep.mubr.msk.f32.mxu1 %vm5485_vm1, %v5486_v13  ;;  %v5808_v56 = vsub.f32 %v1759_v51, %v5801_v53 }
 0x111   : > { %4772 = vmatmul.mubr.f32.vlgmr.msra.gmra.mrb[0].mxu0 %v5747_v19  ;;  %4901 = vmatprep.subr.bf16.mxu1 %v5484_v12  ;;  %v1320_v27 = vand.u32 4294901760, %v1319_v25 }
 0x112   : > { %4882 = vmatpush3.bf16.msra.mxu0 %v4881_v57  ;;  %4778 = vmatprep.mubr.msk.f32.mxu0 %vm5485_vm1, %v5486_v13  ;;  %v5810_v57 = vand.u32 4294901760, %v1762_v55 }
 0x113   : > { %4883 = vmatprep.subr.bf16.mxu0 %v5484_v12 }
 0x117   : > { %4821 = vmatmul.mubr.f32.vlgmr.msra.gmra.mrb[0].mxu1 %v363_v20 }
 0x118   : > { %4903 = vmatpush3.bf16.msra.mxu1 %v4893_v37  ;;  %4827 = vmatprep.mubr.msk.f32.mxu1 %vm5485_vm1, %v5486_v13 }
 0x119   : > { %4779 = vmatmul.mubr.f32.vlgmr.msra.gmra.mrb[0].mxu0 %v363_v20  ;;  %4904 = vmatprep.subr.bf16.mxu1 %v5484_v12 }
 0x11a   : > { %4885 = vmatpush3.bf16.msra.mxu0 %v4875_v45  ;;  %4785 = vmatprep.mubr.msk.f32.mxu0 %vm5485_vm1, %v5486_v13 }
 0x11b   : > { %4886 = vmatprep.subr.bf16.mxu0 %v5484_v12 }
 0x11f   : > { %4828 = vmatmul.mubr.f32.vlgmr.msra.gmra.mrb[0].mxu1 %v5750_v23 }
 0x120   : > { %4906 = vmatpush3.bf16.msra.mxu1 %v4905_v58  ;;  %4834 = vmatprep.mubr.msk.f32.mxu1 %vm5485_vm1, %v5486_v13  ;;  %v226_v58 = vld [vmem:[#allocation6 + $0x20] sm:$0xff] }
 0x121   : > { %4786 = vmatmul.mubr.f32.vlgmr.msra.gmra.mrb[0].mxu0 %v5750_v23  ;;  %4907 = vmatprep.subr.bf16.mxu1 %v5484_v12  ;;  %v1765_v61 = vsel %vm288_vm2, %v226_v58, 0 }
 0x122   : > { %4888 = vmatpush3.bf16.msra.mxu0 %v4887_v59  ;;  %4792 = vmatprep.mubr.msk.f32.mxu0 %vm5485_vm1, %v5486_v13  ;;  %v1859_v59 = vand.u32 4294901760, %v5804_v54 }
 0x123   : > { %4889 = vmatprep.subr.bf16.mxu0 %v5484_v12 }
 0x127   : > { %4835 = vmatmul.mubr.f32.vlgmr.msra.gmra.mrb[0].mxu1 %v5747_v19 }
 0x128   : > { %4909 = vmatpush3.bf16.msra.mxu1 %v4893_v37  ;;  %4841 = vmatprep.mubr.msk.f32.mxu1 %vm5485_vm1, %v5486_v13 }
 0x129   : > { %4793 = vmatmul.mubr.f32.vlgmr.msra.gmra.mrb[0].mxu0 %v5747_v19 }
 0x12a   : > { %4891 = vmatpush3.bf16.msra.mxu0 %v4875_v45  ;;  %4799 = vmatprep.mubr.msk.f32.mxu0 %vm5485_vm1, %v5486_v13  ;;  %vm2805_vm1 = vcmask 1039360  }
 0x12f   : > { %4842 = vmatmul.mubr.f32.vlgmr.msra.gmra.mrb[0].mxu1 %v5747_v19 }
 0x130   : > { %1856 = vmatprep.mubr.f32.mxu1 %v5486_v13 }
 0x131   : > { %4800 = vmatmul.mubr.f32.vlgmr.msra.gmra.mrb[0].mxu0 %v5747_v19 }
 0x132   : > { %4846 = vmatprep.mubr.f32.mxu0 %v1310_v4  ;;  %v1870_v4 = vand.u32 4294901760, %v5808_v56 }
 0x202   : > { %v1213_v12 = vpop.f32.mrb[0].mxu1 }
 0x203   : > { %v4959_v14 = vadd.f32 %v1213_v12, %v286_v5  ;;  %v4843_v17 = vpop.f32.mrb[1].mxu1 }
 0x204   : > { %v750_v18 = vpop.f32.mrb[0].mxu0 }
 0x205   : > { %v4958_v19 = vadd.f32 %v750_v18, %v286_v5  ;;  %v4801_v20 = vpop.f32.mrb[1].mxu0  ;;  %v1217_v22 = vmax.f32 %v4959_v14, 0.0  ;;  %v5822_v5 = vsub.f32 %v1762_v55, %v5810_v57  ;;  %v1871_v18 = vsub.f32 %v5808_v56, %v1870_v4  ;;  %v230_v55 = vld [vmem:[#allocation6 + $0x40] sm:$0xff] }
 0x207   : > { %v754_v23 = vmax.f32 %v4958_v19, 0.0  ;;  %v1881_v19 = vand.u32 4294901760, %v5822_v5  ;;  %v1872_v32 = vand.u32 4294901760, %v1871_v18 }
 0x209   : > { %v1218_v24 = vadd.f32 %v1217_v22, %v754_v23 }
 0x20b   : > { %v1238_v16 = vsel %vm1236_vm4, %v1218_v24, 0  ;;  %v228_v24 = vld [vmem:[#allocation6 + $0x30] sm:$0xff]  ;;  %vm6570_vm4 = vcmask 924672  }
 0x20c   : > { %v1241_v26 = vand.u32 4294901760, %v1238_v16 }
 0x20e   : > { %v1328_v28 = vsub.f32 %v1238_v16, %v1241_v26  ;;  %4844 = vmatprep.subr.mxu0 %v1241_v26 }
 0x20f   : > { %4845 = vmatpush3.msra.mxu0 %v1241_v26 }
 0x210   : > { %4847 = vmatmul.mubr.f32.vlgmr.msra.gmra.mrb[2].mxu0 %v1320_v27  ;;  %v1329_v29 = vand.u32 4294901760, %v1328_v28 }
 0x211   : > { %4851 = vmatprep.mubr.f32.mxu0 %v1306_v62 }
 0x212   : > { %v1330_v30 = vsub.f32 %v1328_v28, %v1329_v29 }
 0x214   : > { %v1331_v31 = vand.u32 4294901760, %v1330_v30 }
 0x216   : > { %4849 = vmatprep.subr.mxu0 %v1331_v31 }
 0x217   : > { %4850 = vmatpush3.msra.mxu0 %v1331_v31 }
 0x218   : > { %4852 = vmatmul.mubr.f32.vlgmr.msra.gmra.mrb[2].mxu0 %v1316_v10  ;;  %4854 = vmatprep.subr.mxu0 %v1328_v28 }
 0x219   : > { %4855 = vmatpush3.msra.mxu0 %v1328_v28  ;;  %4856 = vmatprep.mubr.f32.mxu0 %v1307_v63 }
 0x21a   : > { %4859 = vmatprep.subr.mxu0 %v1241_v26 }
 0x220   : > { %4857 = vmatmul.mubr.f32.vlgmr.msra.gmra.mrb[2].mxu0 %v1317_v11  ;;  %v5837_v11 = vand.u32 4294901760, %v1765_v61 }
 0x221   : > { %4860 = vmatpush3.msra.mxu0 %v1241_v26  ;;  %4861 = vmatprep.mubr.f32.mxu0 %v1308_v2 }
 0x222   : > { %4864 = vmatprep.subr.mxu0 %v1329_v29 }
 0x228   : > { %4862 = vmatmul.mubr.f32.vlgmr.msra.gmra.mrb[2].mxu0 %v1318_v21 }
 0x229   : > { %4865 = vmatpush3.msra.mxu0 %v1329_v29  ;;  %4866 = vmatprep.mubr.f32.mxu0 %v1306_v62 }
 0x22a   : > { %4869 = vmatprep.subr.mxu0 %v1241_v26 }
 0x230   : > { %4867 = vmatmul.mubr.f32.vlgmr.msra.gmra.mrb[2].mxu0 %v1316_v10 }
 0x231   : > { %4870 = vmatpush3.msra.mxu0 %v1241_v26  ;;  %4871 = vmatprep.mubr.f32.mxu0 %v1306_v62  ;;  %v227_v62 = vld [vmem:[#allocation6 + $0x28] sm:$0xff]  ;;  %v5857_v26 = vsub.f32 %v1765_v61, %v5837_v11 }
 0x232   : > { %v1768_v12 = vsel %vm288_vm2, %v227_v62, 0 }
 0x233   : > { %v5859_v27 = vand.u32 4294901760, %v1768_v12 }
 0x238   : > { %4872 = vmatmul.mubr.f32.vlgmr.msra.gmra.mrb[2].mxu0 %v1316_v10 }
 0x239   : > { %2974 = vmatprep.mubr.f32.mxu0 %v5486_v13 }
 0x30b   : > { %v4873_v35 = vpop.f32.mrb[2].mxu0 }
 0x30c   : > { %v4960_v36 = vadd.f32 %v4873_v35, %v1228_v33  ;;  %v1719_v37 = vpop.f32.mrb[3].mxu0  ;;  %v1771_v35 = vsel %vm288_vm2, %v228_v24, 0 }
 0x30d   : > { %v4961_v38 = vadd.f32 %v1719_v37, %v1226_v34  ;;  %v1882_v34 = vsub.f32 %v5822_v5, %v1881_v19  ;;  %v5879_v48 = vand.u32 4294901760, %v1771_v35 }
 0x30e   : > { %v4694_v39 = vmul.f32 -1.442695, %v4960_v36 }
 0x30f   : > { %v4693_v40 = vmul.f32 -1.442695, %v4961_v38  ;;  %v1883_v61 = vand.u32 4294901760, %v1882_v34 }
 0x310   : > { %5289 = vpow2.f32 %v4694_v39  ;;  %v229_v39 = vld [vmem:[#allocation6 + $0x38] sm:$0xff] }
 0x311   : > { %5291 = vpow2.f32 %v4693_v40  ;;  %v1774_v51 = vsel %vm288_vm2, %v229_v39, 0 }
 0x31a   : > { %v5290_v41 = vpop.eup %5289 }
 0x31b   : > { %v5292_v42 = vpop.eup %5291  ;;  %v1736_v43 = vadd.f32 1.0, %v5290_v41 }
 0x31c   : > { %v1735_v44 = vadd.f32 1.0, %v5292_v42  ;;  %v1892_v42 = vand.u32 4294901760, %v5857_v26 }
 0x31d   : > { %5293 = vrcp.f32 %v1736_v43  ;;  %v5875_v43 = vsub.f32 %v1768_v12, %v5859_v27  ;;  %v231_v12 = vld [vmem:[#allocation6 + $0x48] sm:$0xff] }
 0x31e   : > { %5295 = vrcp.f32 %v1735_v44  ;;  %v1893_v62 = vsub.f32 %v5857_v26, %v1892_v42 }
 0x327   : > { %v5294_v45 = vpop.eup %5293 }
 0x328   : > { %v5296_v46 = vpop.eup %5295  ;;  %1748 = vperm.xlu1 %5282, %v5294_v45  }
 0x329   : > { %1743 = vperm.xlu0 %5283, %v5296_v46  }
 0x3a7   : > { %v1749_v60 = vpop.permute.xlu1 %1748 }
 0x3a8   : > { %v5815_v63 = vmul.f32 %v1749_v60, %v5711_v0  ;;  %v5818_v2 = vmul.f32 %v1749_v60, %v5714_v1  ;;  %v1744_v3 = vpop.permute.xlu0 %1743  ;;  %v1860_v0 = vsub.f32 %v5804_v54, %v1859_v59  ;;  %v1903_v60 = vand.u32 4294901760, %v5875_v43 }
 0x3a9   : > { %v5825_v8 = vmul.f32 %v1744_v3, %v5725_v6  ;;  %v5828_v9 = vmul.f32 %v1744_v3, %v5728_v7  ;;  %v5888_v3 = vsub.f32 %v1771_v35, %v5879_v48 }
 0x3aa   : > { %v1783_v1 = vsel %vm268_vm0, %v5815_v63, 0  ;;  %v1786_v10 = vsel %vm268_vm0, %v5818_v2, 0  ;;  %v1861_v30 = vand.u32 4294901760, %v1860_v0  ;;  %v5890_v0 = vand.u32 4294901760, %v1774_v51 }
 0x3ab   : > { %v1792_v14 = vand.u32 4294901760, %v1786_v10  ;;  %v1794_v6 = vand.u32 4294901760, %v1783_v1  ;;  %v1790_v17 = vand.u32 4294901760, %v5825_v8  ;;  %v1788_v7 = vand.u32 4294901760, %v5828_v9 }
 0x3ad   : > { %v1969_v20 = vsub.f32 %v1786_v10, %v1792_v14  ;;  %v5846_v21 = vsub.f32 %v1783_v1, %v1794_v6  ;;  %v5849_v22 = vsub.f32 %v5825_v8, %v1790_v17  ;;  %v5851_v23 = vpack.c.bf16 %v1792_v14, %v1788_v7 }
 0x3ae   : > { %v1957_v25 = vsub.f32 %v5828_v9, %v1788_v7  ;;  %v5854_v16 = vpack.c.bf16 %v1794_v6, %v1790_v17  ;;  %v1777_v10 = vsel %vm288_vm2, %v230_v55, 0  ;;  %v1904_v14 = vsub.f32 %v5875_v43, %v1903_v60 }
 0x3af   : > { %v1976_v28 = vand.u32 4294901760, %v5846_v21  ;;  %v1964_v29 = vand.u32 4294901760, %v5849_v22  ;;  %4911 = vmatprep.subr.bf16.mxu1 %v5851_v23  ;;  %v1970_v31 = vand.u32 4294901760, %v1969_v20  ;;  %v1894_v6 = vand.u32 4294901760, %v1893_v62 }
 0x3b0   : > { %4913 = vmatpush1.bf16.msra.mxu1 %v5854_v16  ;;  %v1958_v33 = vand.u32 4294901760, %v1957_v25  ;;  %v4918_v1 = vpack.c.bf16 %v1969_v20, %v1957_v25  ;;  %v1914_v17 = vand.u32 4294901760, %v5888_v3  ;;  %v5899_v7 = vsub.f32 %v1774_v51, %v5890_v0 }
 0x3b1   : > { %v1977_v36 = vsub.f32 %v5846_v21, %v1976_v28  ;;  %v1971_v37 = vsub.f32 %v1969_v20, %v1970_v31  ;;  %v1965_v38 = vsub.f32 %v5849_v22, %v1964_v29  ;;  %v5871_v40 = vpack.c.bf16 %v1976_v28, %v1964_v29 }
 0x3b2   : > { %v1959_v41 = vsub.f32 %v1957_v25, %v1958_v33  ;;  %v5877_v44 = vpack.c.bf16 %v1970_v31, %v1958_v33  ;;  %v5901_v18 = vand.u32 4294901760, %v1777_v10  ;;  %v1780_v20 = vsel %vm288_vm2, %v231_v12, 0 }
 0x3b3   : > { %1862 = vmatmul.mubr.f32.vlgmr.msra.gmra.mrb[2].mxu1 %v1861_v30  ;;  %v1972_v45 = vand.u32 4294901760, %v1971_v37  ;;  %v1966_v46 = vand.u32 4294901760, %v1965_v38  ;;  %v1978_v47 = vand.u32 4294901760, %v1977_v36  ;;  %v1905_v24 = vand.u32 4294901760, %v1904_v14 }
 0x3b4   : > { %1867 = vmatprep.mubr.f32.mxu1 %v5486_v13  ;;  %v1960_v49 = vand.u32 4294901760, %v1959_v41  ;;  %v1915_v25 = vsub.f32 %v5888_v3, %v1914_v17  ;;  %v1925_v28 = vand.u32 4294901760, %v5899_v7  ;;  %v5910_v29 = vsub.f32 %v1777_v10, %v5901_v18 }
 0x3b5   : > { %v4916_v52 = vpack.c.bf16 %v1978_v47, %v1966_v46  ;;  %v5912_v30 = vand.u32 4294901760, %v1780_v20  ;;  %v5493_v46 = vmov 13   ;;  %v5975_v47 = vld [vmem:[#allocation2 + $0x60] sm:$0xff] }
 0x3b6   : > { %v4914_v58 = vpack.c.bf16 %v1972_v45, %v1960_v49  ;;  %v1916_v31 = vand.u32 4294901760, %v1915_v25  ;;  %v1936_v33 = vand.u32 4294901760, %v5910_v29  ;;  %v4920_v45 = vpack.c.bf16 %v5846_v21, %v5849_v22  ;;  %v5964_v21 = vld [vmem:[#allocation2] sm:$0xff]  ;;  %5284 = vset.pattern.permute.xlu0 %v5493_v46  ;;  %v5981_v49 = vld [vmem:[#allocation2 + $0xd8] sm:$0xff] }
 0x3b7   : > { %1873 = vmatmul.mubr.f32.gmra.mrb[4].mxu1 %v1872_v32  ;;  %v1926_v32 = vsub.f32 %v5899_v7, %v1925_v28  ;;  %v5920_v34 = vsub.f32 %v1780_v20, %v5912_v30  ;;  %2699 = vrot.lane.b32.xlu0 %v5964_v21, %s5491_s24  ;;  %v5969_v22 = vld [vmem:[#allocation2 + $0x20] sm:$0xff] }
 0x3b8   : > { %4915 = vmatprep.subr.bf16.mxu1 %v4914_v58  ;;  %1878 = vmatprep.mubr.f32.mxu1 %v5486_v13  ;;  %v1937_v36 = vsub.f32 %v5910_v29, %v1936_v33 }
 0x3b9   : > { %4917 = vmatpush1.bf16.msra.mxu1 %v4916_v52  ;;  %v1927_v35 = vand.u32 4294901760, %v1926_v32  ;;  %v1947_v37 = vand.u32 4294901760, %v5920_v34  ;;  %2724 = vrot.lane.b32.xlu1 %v5969_v22, %s5492_s26  ;;  %v2866_v52 = vld [vmem:[#allocation2 + $0x118] sm:$0xff] }
 0x3ba   : > { %4919 = vmatprep.subr.bf16.mxu1 %v4918_v1  ;;  %v1938_v38 = vand.u32 4294901760, %v1937_v36 }
 0x3bb   : > { %1884 = vmatmul.mubr.f32.gmra.mrb[6].mxu1 %v1883_v61  ;;  %v1948_v39 = vsub.f32 %v5920_v34, %v1947_v37 }
 0x3bc   : > { %1889 = vmatprep.mubr.f32.mxu1 %v5486_v13 }
 0x3bd   : > { %v1949_v41 = vand.u32 4294901760, %v1948_v39  ;;  %2774 = vrot.lane.b32.xlu1 %v5975_v47, %s5495_s23 }
 0x3bf   : > { %1895 = vmatmul.mubr.f32.gmra.mrb[8].mxu1 %v1894_v6 }
 0x3c0   : > { %1900 = vmatprep.mubr.f32.mxu1 %v5486_v13 }
 0x3c3   : > { %1906 = vmatmul.mubr.f32.gmra.mrb[10].mxu1 %v1905_v24 }
 0x3c4   : > { %1911 = vmatprep.mubr.f32.mxu1 %v5486_v13 }
 0x3c7   : > { %1917 = vmatmul.mubr.f32.gmra.mrb[12].mxu1 %v1916_v31 }
 0x3c8   : > { %1922 = vmatprep.mubr.f32.mxu1 %v5486_v13 }
 0x3cb   : > { %1928 = vmatmul.mubr.f32.gmra.mrb[14].mxu1 %v1927_v35 }
 0x3cc   : > { %1933 = vmatprep.mubr.f32.mxu1 %v5486_v13 }
 0x3cf   : > { %1939 = vmatmul.mubr.f32.gmra.mrb[16].mxu1 %v1938_v38 }
 0x3d0   : > { %1944 = vmatprep.mubr.f32.mxu1 %v5486_v13 }
 0x3d3   : > { %1950 = vmatmul.mubr.f32.gmra.mrb[18].mxu1 %v1949_v41 }
 0x3d4   : > { %2040 = vmatprep.mubr.f32.mxu1 %v5486_v13 }
 0x3d7   : > { %2042 = vmatmul.mubr.f32.vlgmr.msra.gmra.mrb[2].mxu1 %v5798_v50 }
 0x3d8   : > { %4921 = vmatpush1.bf16.msra.mxu1 %v4920_v45  ;;  %2047 = vmatprep.mubr.f32.mxu1 %v5486_v13 }
 0x3d9   : > { %4923 = vmatprep.subr.bf16.mxu1 %v5851_v23 }
 0x3db   : > { %2049 = vmatmul.mubr.f32.gmra.mrb[4].mxu1 %v5801_v53 }
 0x3dc   : > { %2054 = vmatprep.mubr.f32.mxu1 %v5486_v13 }
 0x3df   : > { %2056 = vmatmul.mubr.f32.gmra.mrb[6].mxu1 %v5810_v57 }
 0x3e0   : > { %2061 = vmatprep.mubr.f32.mxu1 %v5486_v13 }
 0x3e3   : > { %2063 = vmatmul.mubr.f32.gmra.mrb[8].mxu1 %v5837_v11 }
 0x3e4   : > { %2068 = vmatprep.mubr.f32.mxu1 %v5486_v13 }
 0x3e7   : > { %2070 = vmatmul.mubr.f32.gmra.mrb[10].mxu1 %v5859_v27 }
 0x3e8   : > { %2075 = vmatprep.mubr.f32.mxu1 %v5486_v13 }
 0x3eb   : > { %2077 = vmatmul.mubr.f32.gmra.mrb[12].mxu1 %v5879_v48 }
 0x3ec   : > { %2082 = vmatprep.mubr.f32.mxu1 %v5486_v13 }
 0x3ef   : > { %2084 = vmatmul.mubr.f32.gmra.mrb[14].mxu1 %v5890_v0 }
 0x3f0   : > { %2089 = vmatprep.mubr.f32.mxu1 %v5486_v13 }
 0x3f3   : > { %2091 = vmatmul.mubr.f32.gmra.mrb[16].mxu1 %v5901_v18 }
 0x3f4   : > { %2096 = vmatprep.mubr.f32.mxu1 %v5486_v13 }
 0x3f7   : > { %2098 = vmatmul.mubr.f32.gmra.mrb[18].mxu1 %v5912_v30 }
 0x3f8   : > { %2176 = vmatprep.mubr.f32.mxu1 %v5486_v13 }
 0x3fb   : > { %2179 = vmatmul.mubr.f32.vlgmr.msra.gmra.mrb[2].mxu1 %v5804_v54  ;;  %v5499_v54 = vmov 14  }
 0x3fc   : > { %4925 = vmatpush1.bf16.msra.mxu1 %v5854_v16  ;;  %2184 = vmatprep.mubr.f32.mxu1 %v5486_v13 }
 0x3fd   : > { %4927 = vmatprep.subr.bf16.mxu1 %v5877_v44  ;;  %v5971_v44 = vld [vmem:[#allocation2 + $0x40] sm:$0xff] }
 0x3fe   : > { %2749 = vrot.lane.b32.xlu0 %v5971_v44, %s5494_s27 }
 0x3ff   : > { %2187 = vmatmul.mubr.f32.gmra.mrb[4].mxu1 %v5808_v56 }
 0x400   : > { %2192 = vmatprep.mubr.f32.mxu1 %v5486_v13 }
 0x402   : > { %2828 = vrot.lane.b32.xlu0 %v5981_v49, %s5496_s5 }
 0x403   : > { %2195 = vmatmul.mubr.f32.gmra.mrb[6].mxu1 %v5822_v5 }
 0x404   : > { %2200 = vmatprep.mubr.f32.mxu1 %v5486_v13 }
 0x406   : > { %2890 = vperm.xlu0 %5284, %v5740_v15  }
 0x407   : > { %2203 = vmatmul.mubr.f32.gmra.mrb[8].mxu1 %v5857_v26 }
 0x408   : > { %2208 = vmatprep.mubr.f32.mxu1 %v5486_v13 }
 0x40a   : > { %5285 = vset.pattern.permute.xlu0 %v5499_v54 }
 0x40b   : > { %2211 = vmatmul.mubr.f32.gmra.mrb[10].mxu1 %v5875_v43 }
 0x40c   : > { %2216 = vmatprep.mubr.f32.mxu1 %v5486_v13 }
 0x40f   : > { %2219 = vmatmul.mubr.f32.gmra.mrb[12].mxu1 %v5888_v3 }
 0x410   : > { %2224 = vmatprep.mubr.f32.mxu1 %v5486_v13 }
 0x413   : > { %2227 = vmatmul.mubr.f32.gmra.mrb[14].mxu1 %v5899_v7  ;;  %v244_v7 = vlaneseq }
 0x414   : > { %2232 = vmatprep.mubr.f32.mxu1 %v5486_v13 }
 0x415   : > { %v6104_v20 = vand.u32 127, %v244_v7 }
 0x417   : > { %2235 = vmatmul.mubr.f32.gmra.mrb[16].mxu1 %v5910_v29  ;;  %v6107_v25 = vadd.s32 128, %v6104_v20  ;;  %vm6567_vm6 = vcmp.ge.s32.totalorder %v6104_v20, 16 }
 0x418   : > { %2240 = vmatprep.mubr.f32.mxu1 %v5486_v13 }
 0x41b   : > { %2243 = vmatmul.mubr.f32.gmra.mrb[18].mxu1 %v5920_v34 }
 0x41c   : > { %2317 = vmatprep.mubr.f32.mxu1 %v5486_v13 }
 0x41f   : > { %2321 = vmatmul.mubr.f32.vlgmr.msra.gmra.mrb[2].mxu1 %v1859_v59 }
 0x420   : > { %4929 = vmatpush1.bf16.msra.mxu1 %v5871_v40  ;;  %2326 = vmatprep.mubr.f32.mxu1 %v5486_v13 }
 0x421   : > { %4931 = vmatprep.subr.bf16.mxu1 %v5851_v23 }
 0x423   : > { %2330 = vmatmul.mubr.f32.gmra.mrb[4].mxu1 %v1870_v4 }
 0x424   : > { %2335 = vmatprep.mubr.f32.mxu1 %v5486_v13 }
 0x427   : > { %2339 = vmatmul.mubr.f32.gmra.mrb[6].mxu1 %v1881_v19 }
 0x428   : > { %2344 = vmatprep.mubr.f32.mxu1 %v5486_v13 }
 0x429   : > { %v2700_v61 = vpop.permute.xlu0 %2699 }
 0x42b   : > { %2348 = vmatmul.mubr.f32.gmra.mrb[8].mxu1 %v1892_v42 }
 0x42c   : > { %2353 = vmatprep.mubr.f32.mxu1 %v5486_v13 }
 0x42f   : > { %2357 = vmatmul.mubr.f32.gmra.mrb[10].mxu1 %v1903_v60 }
 0x430   : > { %2362 = vmatprep.mubr.f32.mxu1 %v5486_v13 }
 0x433   : > { %2366 = vmatmul.mubr.f32.gmra.mrb[12].mxu1 %v1914_v17 }
 0x434   : > { %2371 = vmatprep.mubr.f32.mxu1 %v5486_v13 }
 0x437   : > { %2375 = vmatmul.mubr.f32.gmra.mrb[14].mxu1 %v1925_v28  ;;  %v247_v28 = vand.u32 15, %v6104_v20 }
 0x438   : > { %2380 = vmatprep.mubr.f32.mxu1 %v5486_v13 }
 0x439   : > { %vm6111_vm5 = vcmp.ge.s32.totalorder %v247_v28, 1  ;;  %vm6130_vm11 = vcmp.le.s32.totalorder %v247_v28, 14 }
 0x43a   : > { %vm6125_vm10 = vmand %vm6567_vm6, %vm6111_vm5 }
 0x43b   : > { %2384 = vmatmul.mubr.f32.gmra.mrb[16].mxu1 %v1936_v33  ;;  %vm6143_vm14 = vmand %vm6567_vm6, %vm6130_vm11 }
 0x43c   : > { %2389 = vmatprep.mubr.f32.mxu1 %v5486_v13 }
 0x43f   : > { %2393 = vmatmul.mubr.f32.gmra.mrb[18].mxu1 %v1947_v37 }
 0x440   : > { %2475 = vmatprep.mubr.f32.mxu1 %v5486_v13 }
 0x443   : > { %2477 = vmatmul.mubr.f32.vlgmr.msra.gmra.mrb[2].mxu1 %v5798_v50 }
 0x444   : > { %4933 = vmatpush1.bf16.msra.mxu1 %v5854_v16  ;;  %2482 = vmatprep.mubr.f32.mxu1 %v5486_v13 }
 0x447   : > { %2484 = vmatmul.mubr.f32.gmra.mrb[4].mxu1 %v5801_v53 }
 0x448   : > { %2489 = vmatprep.mubr.f32.mxu1 %v5486_v13 }
 0x44b   : > { %2491 = vmatmul.mubr.f32.gmra.mrb[6].mxu1 %v5810_v57 }
 0x44c   : > { %2496 = vmatprep.mubr.f32.mxu1 %v5486_v13 }
 0x44f   : > { %2498 = vmatmul.mubr.f32.gmra.mrb[8].mxu1 %v5837_v11 }
 0x450   : > { %2503 = vmatprep.mubr.f32.mxu1 %v5486_v13 }
 0x453   : > { %2505 = vmatmul.mubr.f32.gmra.mrb[10].mxu1 %v5859_v27 }
 0x454   : > { %2510 = vmatprep.mubr.f32.mxu1 %v5486_v13 }
 0x457   : > { %2512 = vmatmul.mubr.f32.gmra.mrb[12].mxu1 %v5879_v48 }
 0x458   : > { %2517 = vmatprep.mubr.f32.mxu1 %v5486_v13 }
 0x45b   : > { %2519 = vmatmul.mubr.f32.gmra.mrb[14].mxu1 %v5890_v0 }
 0x45c   : > { %2524 = vmatprep.mubr.f32.mxu1 %v5486_v13 }
 0x45f   : > { %2526 = vmatmul.mubr.f32.gmra.mrb[16].mxu1 %v5901_v18 }
 0x460   : > { %2531 = vmatprep.mubr.f32.mxu1 %v5486_v13 }
 0x463   : > { %2533 = vmatmul.mubr.f32.gmra.mrb[18].mxu1 %v5912_v30 }
 0x464   : > { %2607 = vmatprep.mubr.f32.mxu1 %v5486_v13 }
 0x467   : > { %2609 = vmatmul.mubr.f32.vlgmr.msra.gmra.mrb[2].mxu1 %v5798_v50  ;;  %v2791_v50 = vld [vmem:[#allocation2 + $0xb8] sm:$0xff] }
 0x468   : > { %2614 = vmatprep.mubr.f32.mxu1 %v5486_v13  ;;  %2803 = vrot.lane.b32.xlu1 %v2791_v50, %s5497_s10 }
 0x46b   : > { %2616 = vmatmul.mubr.f32.gmra.mrb[4].mxu1 %v5801_v53  ;;  %v2841_v53 = vld [vmem:[#allocation2 + $0xf8] sm:$0xff] }
 0x46c   : > { %2621 = vmatprep.mubr.f32.mxu1 %v5486_v13  ;;  %2853 = vrot.lane.b32.xlu1 %v2841_v53, %s5498_s11 }
 0x46f   : > { %2623 = vmatmul.mubr.f32.gmra.mrb[6].mxu1 %v5810_v57 }
 0x470   : > { %2628 = vmatprep.mubr.f32.mxu1 %v5486_v13  ;;  %v2750_v3 = vpop.permute.xlu0 %2749 }
 0x473   : > { %2630 = vmatmul.mubr.f32.gmra.mrb[8].mxu1 %v5837_v11 }
 0x474   : > { %2635 = vmatprep.mubr.f32.mxu1 %v5486_v13  ;;  %v6100_v1 = vpop.permute.xlu0 %2828 }
 0x477   : > { %2637 = vmatmul.mubr.f32.gmra.mrb[10].mxu1 %v5859_v27 }
 0x478   : > { %2642 = vmatprep.mubr.f32.mxu1 %v5486_v13 }
 0x47b   : > { %2644 = vmatmul.mubr.f32.gmra.mrb[12].mxu1 %v5879_v48 }
 0x47c   : > { %2649 = vmatprep.mubr.f32.mxu1 %v5486_v13 }
 0x47f   : > { %2651 = vmatmul.mubr.f32.gmra.mrb[14].mxu1 %v5890_v0 }
 0x480   : > { %2656 = vmatprep.mubr.f32.mxu1 %v5486_v13 }
 0x483   : > { %2658 = vmatmul.mubr.f32.gmra.mrb[16].mxu1 %v5901_v18 }
 0x484   : > { %2663 = vmatprep.mubr.f32.mxu1 %v5486_v13 }
 0x485   : > { %v6102_v12 = vpop.permute.xlu0 %2890 }
 0x487   : > { %2665 = vmatmul.mubr.f32.gmra.mrb[18].mxu1 %v5912_v30  ;;  %v248_v30 = vand.u32 15, %v6107_v25 }
 0x488   : > { %3567 = vmatprep.mubr.f32.mxu1 %v5486_v13 }
 0x489   : > { %vm6116_vm8 = vcmp.ge.s32.totalorder %v248_v30, 1  ;;  %vm6148_vm15 = vcmp.le.s32.totalorder %v248_v30, 14 }
 0x53a   : > { %v2610_v56 = vpop.f32.mrb[2].mxu1 }
 0x53b   : > { %v2612_v57 = vpop.f32.mrb[3].mxu1  ;;  %2701 = vrot.lane.b32.xlu1 %v2610_v56, %s5491_s24 }
 0x53e   : > { %v2617_v59 = vpop.f32.mrb[4].mxu1 }
 0x53f   : > { %v2619_v4 = vpop.f32.mrb[5].mxu1  ;;  %2703 = vrot.lane.b32.xlu1 %v2612_v57, %s5491_s24  ;;  %2726 = vrot.lane.b32.xlu0 %v2617_v59, %s5492_s26 }
 0x542   : > { %v2624_v5 = vpop.f32.mrb[6].mxu1 }
 0x543   : > { %v2626_v11 = vpop.f32.mrb[7].mxu1  ;;  %2728 = vrot.lane.b32.xlu1 %v2619_v4, %s5492_s26  ;;  %2751 = vrot.lane.b32.xlu0 %v2624_v5, %s5494_s27 }
 0x546   : > { %v2631_v19 = vpop.f32.mrb[8].mxu1 }
 0x547   : > { %v2633_v23 = vpop.f32.mrb[9].mxu1  ;;  %2753 = vrot.lane.b32.xlu1 %v2626_v11, %s5494_s27 }
 0x548   : > { %2778 = vrot.lane.b32.xlu0 %v2633_v23, %s5495_s23 }
 0x54a   : > { %v6071_v16 = vpop.f32.mrb[10].mxu1 }
 0x54b   : > { %v6073_v26 = vpop.f32.mrb[11].mxu1  ;;  %2776 = vrot.lane.b32.xlu1 %v2631_v19, %s5495_s23 }
 0x54e   : > { %v2645_v27 = vpop.f32.mrb[12].mxu1 }
 0x54f   : > { %v2647_v40 = vpop.f32.mrb[13].mxu1  ;;  %2799 = vrot.lane.b32.xlu0 %v2645_v27, %s5497_s10  ;;  %v6166_v27 = vld [vmem:[#allocation8] sm:$0xff] }
 0x552   : > { %v2652_v42 = vpop.f32.mrb[14].mxu1 }
 0x553   : > { %v2654_v43 = vpop.f32.mrb[15].mxu1  ;;  %2801 = vrot.lane.b32.xlu0 %v2647_v40, %s5497_s10  ;;  %2824 = vrot.lane.b32.xlu1 %v2652_v42, %s5496_s5 }
 0x556   : > { %v2659_v48 = vpop.f32.mrb[16].mxu1 }
 0x557   : > { %v2661_v51 = vpop.f32.mrb[17].mxu1  ;;  %2896 = vperm.xlu0 %5285, %v5740_v15   ;;  %2826 = vrot.lane.b32.xlu1 %v2654_v43, %s5496_s5  ;;  %v2725_v15 = vpop.permute.xlu1 %2724 }
 0x55a   : > { %v2666_v55 = vpop.f32.mrb[18].mxu1 }
 0x55b   : > { %v2668_v58 = vpop.f32.mrb[19].mxu1  ;;  %2849 = vrot.lane.b32.xlu1 %v2659_v48, %s5498_s11  ;;  %2878 = vrot.lane.b32.xlu0 %v2866_v52, %s5500_s25  ;;  %v2775_v60 = vpop.permute.xlu1 %2774 }
 0x55f   : > { %2851 = vrot.lane.b32.xlu1 %v2661_v51, %s5498_s11  ;;  %4406 = vrot.lane.b32.xlu0 %v5964_v21, %s5491_s24  ;;  %v2804_v62 = vpop.permute.xlu1 %2803 }
 0x563   : > { %2876 = vrot.lane.b32.xlu1 %v2668_v58, %s5500_s25  ;;  %4446 = vrot.lane.b32.xlu0 %v5971_v44, %s5494_s27  ;;  %v6098_v0 = vpop.permute.xlu1 %2853 }
 0x567   : > { %2874 = vrot.lane.b32.xlu1 %v2666_v55, %s5500_s25  ;;  %4490 = vrot.lane.b32.xlu0 %v2791_v50, %s5497_s10 }
 0x56b   : > { %4426 = vrot.lane.b32.xlu1 %v5969_v22, %s5492_s26 }
 0x56f   : > { %4466 = vrot.lane.b32.xlu1 %v5975_v47, %s5495_s23 }
 0x573   : > { %4510 = vrot.lane.b32.xlu1 %v5981_v49, %s5496_s5 }
 0x577   : > { %4530 = vrot.lane.b32.xlu1 %v2841_v53, %s5498_s11 }
 0x5ad   : > { %v2702_v10 = vpop.permute.xlu1 %2701 }
 0x5ae   : > { %v2706_v38 = vsel %vm2705_vm7, %v2700_v61, %v2702_v10 }
 0x5af   : > { %v2710_v22 = vsel %vm6125_vm10, %v2706_v38, 0.0 }
 0x5b0   : > { %v2712_v57 = vadd.f32 %v2710_v22, %v6071_v16  ;;  %v2904_v16 = vsel %vm2903_vm3, %v6166_v27, 0 }
 0x5b1   : > { %v2704_v14 = vpop.permute.xlu1 %2703  ;;  %v2727_v17 = vpop.permute.xlu0 %2726 }
 0x5b2   : > { %v2707_v35 = vsel %vm2705_vm7, %v2702_v10, %v2704_v14  ;;  %v2731_v21 = vsel %vm2730_vm9, %v2725_v15, %v2727_v17  ;;  %v6190_v10 = vand.u32 4294901760, %v2904_v16 }
 0x5b3   : > { %v2711_v45 = vsel %vm6116_vm8, %v2707_v35, 0.0  ;;  %v2735_v50 = vsel %vm6567_vm6, %v2731_v21, 0.0  ;;  %vm6571_vm6 = vcmp.lt.s32.totalorder %v6107_v25, 240 }
 0x5b4   : > { %v2713_v49 = vadd.f32 %v2711_v45, %v6073_v26  ;;  %v2737_v19 = vadd.f32 %v2735_v50, %v2712_v57 }
 0x5b5   : > { %v2729_v6 = vpop.permute.xlu1 %2728  ;;  %v2752_v24 = vpop.permute.xlu0 %2751 }
 0x5b6   : > { %v2756_v46 = vsel %vm6569_vm12, %v2750_v3, %v2752_v24  ;;  %v2732_v59 = vsel %vm2730_vm9, %v2727_v17, %v2729_v6 }
 0x5b7   : > { %v2760_v5 = vsel %vm6143_vm14, %v2756_v46, 0.0  ;;  %v2738_v40 = vadd.f32 %v2732_v59, %v2713_v49 }
 0x5b8   : > { %v2762_v51 = vadd.f32 %v2760_v5, %v2737_v19 }
 0x5b9   : > { %v2754_v18 = vpop.permute.xlu1 %2753 }
 0x5ba   : > { %v2779_v31 = vpop.permute.xlu0 %2778  ;;  %v2757_v53 = vsel %vm6569_vm12, %v2752_v24, %v2754_v18  ;;  %vm6182_vm12 = vmand %vm6571_vm6, %vm6116_vm8  ;;  %v5314_v18 = vld [vmem:[#allocation8 + $0x8] sm:$0xf] }
 0x5bb   : > { %v2761_v23 = vsel %vm6148_vm15, %v2757_v53, 0.0  ;;  %v2906_v24 = vsel %vm2903_vm3, %v5314_v18, 0  ;;  %vm6209_vm3 = vmand %vm6571_vm6, %vm6148_vm15 }
 0x5bc   : > { %v2763_v58 = vadd.f32 %v2761_v23, %v2738_v40 }
 0x5bd   : > { %v2777_v29 = vpop.permute.xlu1 %2776 }
 0x5be   : > { %v2781_v4 = vsel %vm6568_vm13, %v2775_v60, %v2777_v29  ;;  %v2782_v11 = vsel %vm6568_vm13, %v2777_v29, %v2779_v31  ;;  %vm2855_vm13 = vcmask 916480  }
 0x5bf   : > { %v2785_v42 = vsel %vm6111_vm5, %v2781_v4, 0.0  ;;  %v2786_v52 = vsel %vm6116_vm8, %v2782_v11, 0.0 }
 0x5c0   : > { %v2788_v14 = vadd.f32 %v2786_v52, %v2763_v58 }
 0x5c1   : > { %v2800_v36 = vpop.permute.xlu0 %2799 }
 0x5c5   : > { %v2825_v33 = vpop.permute.xlu1 %2824  ;;  %v2802_v54 = vpop.permute.xlu0 %2801 }
 0x5c6   : > { %v2806_v26 = vsel %vm2805_vm1, %v2800_v36, %v2802_v54  ;;  %v2807_v43 = vsel %vm2805_vm1, %v2802_v54, %v2804_v62  ;;  %v2787_v62 = vadd.f32 %v2785_v42, %v2762_v51  ;;  %v2976_v36 = vsub.f32 %v2904_v16, %v6190_v10 }
 0x5c7   : > { %v2810_v15 = vsel %vm6130_vm11, %v2806_v26, 0.0  ;;  %v2811_v3 = vsel %vm6148_vm15, %v2807_v43, 0.0 }
 0x5c8   : > { %v2812_v28 = vadd.f32 %v2810_v15, %v2787_v62  ;;  %v2813_v30 = vadd.f32 %v2811_v3, %v2788_v14  ;;  %v2977_v4 = vand.u32 4294901760, %v2976_v36 }
 0x5c9   : > { %v2827_v41 = vpop.permute.xlu1 %2826 }
 0x5ca   : > { %v2831_v55 = vsel %vm6570_vm4, %v2825_v33, %v2827_v41  ;;  %v2832_v61 = vsel %vm6570_vm4, %v2827_v41, %v6100_v1  ;;  %vm2880_vm4 = vcmask 908288   ;;  %v2978_v26 = vsub.f32 %v2976_v36, %v2977_v4 }
 0x5cb   : > { %v2835_v6 = vsel %vm6111_vm5, %v2831_v55, 0.0  ;;  %v2836_v1 = vsel %vm6182_vm12, %v2832_v61, 0.0 }
 0x5cc   : > { %v2837_v33 = vadd.f32 %v2835_v6, %v2812_v28  ;;  %v2838_v38 = vadd.f32 %v2836_v1, %v2813_v30  ;;  %v2979_v51 = vand.u32 4294901760, %v2978_v26 }
 0x5cd   : > { %v2850_v56 = vpop.permute.xlu1 %2849 }
 0x5d1   : > { %v2852_v48 = vpop.permute.xlu1 %2851 }
 0x5d2   : > { %v2857_v17 = vsel %vm2855_vm13, %v2852_v48, %v6098_v0  ;;  %v2856_v31 = vsel %vm2855_vm13, %v2850_v56, %v2852_v48  ;;  %v6203_v0 = vand.u32 4294901760, %v2906_v24 }
 0x5d3   : > { %v2861_v35 = vsel %vm6571_vm6, %v2857_v17, 0.0  ;;  %v2862_v21 = vadd.f32 %v2856_v31, %v2837_v33  ;;  %vm6600_vm6 = vcmask 7168  }
 0x5d4   : > { %v2863_v49 = vadd.f32 %v2861_v35, %v2838_v38  ;;  %v2987_v57 = vsub.f32 %v2906_v24, %v6203_v0 }
 0x5d5   : > { %v2877_v7 = vpop.permute.xlu1 %2876 }
 0x5d6   : > { %v2897_v29 = vpop.permute.xlu0 %2896  ;;  %v2988_v16 = vand.u32 4294901760, %v2987_v57 }
 0x5d8   : > { %v2989_v52 = vsub.f32 %v2987_v57, %v2988_v16 }
 0x5d9   : > { %v2875_v41 = vpop.permute.xlu1 %2874 }
 0x5da   : > { %v2881_v22 = vsel %vm2880_vm4, %v2875_v41, %v2877_v7  ;;  %v2879_v46 = vpop.permute.xlu0 %2878  ;;  %v2990_v61 = vand.u32 4294901760, %v2989_v52  ;;  %v5317_v52 = vld [vmem:[%s5700_s30 + $0x10] sm:$0xf] }
 0x5db   : > { %v2885_v50 = vsel %vm6130_vm11, %v2881_v22, 0.0  ;;  %v2882_v53 = vsel %vm2880_vm4, %v2877_v7, %v2879_v46 }
 0x5dc   : > { %v2887_v54 = vadd.f32 %v2885_v50, %v2862_v21  ;;  %v2886_v56 = vsel %vm6209_vm3, %v2882_v53, 0.0 }
 0x5dd   : > { %v2888_v59 = vadd.f32 %v2886_v56, %v2863_v49 }
 0x5de   : > { %v2893_v5 = vmul.f32 %v6102_v12, %v2887_v54 }
 0x5df   : > { %v2894_v11 = vmul.f32 %v6102_v12, %v2888_v59 }
 0x5e0   : > { %v2899_v19 = vadd.f32 %v2897_v29, %v2893_v5 }
 0x5e1   : > { %v2900_v23 = vadd.f32 %v2897_v29, %v2894_v11  ;;  %v5315_v11 = vld [vmem:[%s5700_s30] sm:$0xff] }
 0x5e2   : > { %v2901_v40 = vmax.f32 %v2899_v19, 0.0 }
 0x5e3   : > { %v2902_v42 = vmax.f32 %v2900_v23, 0.0 }
 0x5e4   : > { %v2910_v43 = vand.u32 4294901760, %v2901_v40 }
 0x5e5   : > { %v2908_v48 = vand.u32 4294901760, %v2902_v42 }
 0x5e6   : > { %v3004_v55 = vsub.f32 %v2901_v40, %v2910_v43 }
 0x5e7   : > { %2909 = vmatprep.subr.mxu0 %v2908_v48  ;;  %v2998_v58 = vsub.f32 %v2902_v42, %v2908_v48 }
 0x5e8   : > { %2911 = vmatpush1.msra.mxu0 %v2910_v43  ;;  %v3005_v15 = vand.u32 4294901760, %v3004_v55 }
 0x5e9   : > { %2980 = vmatmul.mubr.f32.vlgmr.msra.gmra.mrb[4].mxu0 %v2979_v51  ;;  %v2999_v62 = vand.u32 4294901760, %v2998_v58 }
 0x5ea   : > { %2985 = vmatprep.mubr.f32.mxu0 %v5486_v13  ;;  %v3006_v12 = vsub.f32 %v3004_v55, %v3005_v15 }
 0x5eb   : > { %v3000_v3 = vsub.f32 %v2998_v58, %v2999_v62 }
 0x5ec   : > { %v3007_v6 = vand.u32 4294901760, %v3006_v12 }
 0x5ed   : > { %2991 = vmatmul.mubr.f32.gmra.mrb[6].mxu0 %v2990_v61  ;;  %v3001_v14 = vand.u32 4294901760, %v3000_v3 }
 0x5ee   : > { %3071 = vmatprep.mubr.f32.mxu0 %v5486_v13 }
 0x5ef   : > { %3002 = vmatprep.subr.mxu0 %v3001_v14 }
 0x5f0   : > { %3008 = vmatpush1.msra.mxu0 %v3007_v6 }
 0x5f1   : > { %3073 = vmatmul.mubr.f32.vlgmr.msra.gmra.mrb[4].mxu0 %v6190_v10  ;;  %3088 = vmatprep.subr.mxu0 %v2998_v58  ;;  %v5318_v58 = vld [vmem:[%s5700_s30 + $0x18] sm:$0xf] }
 0x5f2   : > { %3091 = vmatpush1.msra.mxu0 %v3004_v55  ;;  %3078 = vmatprep.mubr.f32.mxu0 %v5486_v13 }
 0x5f3   : > { %3172 = vmatprep.subr.mxu0 %v2908_v48 }
 0x5f5   : > { %3080 = vmatmul.mubr.f32.gmra.mrb[6].mxu0 %v6203_v0 }
 0x5f6   : > { %3154 = vmatprep.mubr.f32.mxu0 %v5486_v13 }
 0x5f9   : > { %3157 = vmatmul.mubr.f32.vlgmr.msra.gmra.mrb[4].mxu0 %v2976_v36 }
 0x5fa   : > { %3174 = vmatpush1.msra.mxu0 %v2910_v43  ;;  %3162 = vmatprep.mubr.f32.mxu0 %v5486_v13 }
 0x5fb   : > { %3259 = vmatprep.subr.mxu0 %v2999_v62 }
 0x5fd   : > { %3165 = vmatmul.mubr.f32.gmra.mrb[6].mxu0 %v2987_v57 }
 0x5fe   : > { %3237 = vmatprep.mubr.f32.mxu0 %v5486_v13 }
 0x601   : > { %3241 = vmatmul.mubr.f32.vlgmr.msra.gmra.mrb[4].mxu0 %v2977_v4 }
 0x602   : > { %3263 = vmatpush1.msra.mxu0 %v3005_v15  ;;  %3246 = vmatprep.mubr.f32.mxu0 %v5486_v13 }
 0x603   : > { %3342 = vmatprep.subr.mxu0 %v2908_v48 }
 0x605   : > { %3250 = vmatmul.mubr.f32.gmra.mrb[6].mxu0 %v2988_v16  ;;  %v5316_v16 = vld [vmem:[%s5700_s30 + $0x8] sm:$0xff] }
 0x606   : > { %3326 = vmatprep.mubr.f32.mxu0 %v5486_v13 }
 0x609   : > { %3328 = vmatmul.mubr.f32.vlgmr.msra.gmra.mrb[4].mxu0 %v6190_v10 }
 0x60a   : > { %3344 = vmatpush1.msra.mxu0 %v2910_v43  ;;  %3333 = vmatprep.mubr.f32.mxu0 %v5486_v13 }
 0x60d   : > { %3335 = vmatmul.mubr.f32.gmra.mrb[6].mxu0 %v6203_v0 }
 0x60e   : > { %3407 = vmatprep.mubr.f32.mxu0 %v5486_v13 }
 0x611   : > { %3409 = vmatmul.mubr.f32.vlgmr.msra.gmra.mrb[4].mxu0 %v6190_v10 }
 0x612   : > { %3414 = vmatprep.mubr.f32.mxu0 %v5486_v13 }
 0x615   : > { %3416 = vmatmul.mubr.f32.gmra.mrb[6].mxu0 %v6203_v0 }
 0x616   : > { %3751 = vmatprep.mubr.f32.mxu0 %v5486_v13 }
 0x6e4   : > { %v3410_v17 = vpop.f32.mrb[4].mxu0 }
 0x6e5   : > { %v3422_v7 = vmax.f32 %v3410_v17, 0.0  ;;  %v3412_v18 = vpop.f32.mrb[5].mxu0 }
 0x6e6   : > { %v3423_v24 = vmax.f32 %v3412_v18, 0.0 }
 0x6e7   : > { %v4695_v28 = vmul.f32 -1.442695, %v3422_v7 }
 0x6e8   : > { %v4696_v1 = vmul.f32 -1.442695, %v3423_v24  ;;  %v3417_v29 = vpop.f32.mrb[6].mxu0 }
 0x6e9   : > { %5297 = vpow2.f32 %v4695_v28  ;;  %v3424_v30 = vmax.f32 %v3417_v29, 0.0  ;;  %v3419_v31 = vpop.f32.mrb[7].mxu0 }
 0x6ea   : > { %5299 = vpow2.f32 %v4696_v1  ;;  %v3425_v33 = vmax.f32 %v3419_v31, 0.0 }
 0x6eb   : > { %v4697_v35 = vmul.f32 -1.442695, %v3424_v30 }
 0x6ec   : > { %v4698_v10 = vmul.f32 -1.442695, %v3425_v33 }
 0x6ed   : > { %5301 = vpow2.f32 %v4697_v35 }
 0x6ee   : > { %5303 = vpow2.f32 %v4698_v10 }
 0x6f3   : > { %v5298_v36 = vpop.eup %5297 }
 0x6f4   : > { %v5300_v0 = vpop.eup %5299  ;;  %v3438_v38 = vadd.f32 1.0, %v5298_v36 }
 0x6f5   : > { %v3439_v41 = vadd.f32 1.0, %v5300_v0 }
 0x6f6   : > { %5305 = vrcp.f32 %v3438_v38 }
 0x6f7   : > { %v5302_v21 = vpop.eup %5301  ;;  %5307 = vrcp.f32 %v3439_v41  ;;  %v232_v41 = vld [vmem:[#allocation6 + $0x50] sm:$0xff] }
 0x6f8   : > { %v5304_v22 = vpop.eup %5303  ;;  %v3440_v46 = vadd.f32 1.0, %v5302_v21 }
 0x6f9   : > { %v3441_v49 = vadd.f32 1.0, %v5304_v22 }
 0x6fa   : > { %5309 = vrcp.f32 %v3440_v46 }
 0x6fb   : > { %5311 = vrcp.f32 %v3441_v49 }
 0x700   : > { %v5306_v50 = vpop.eup %5305 }
 0x701   : > { %v5308_v53 = vpop.eup %5307  ;;  %v3450_v54 = vadd.f32 1.0, %v5306_v50 }
 0x702   : > { %v3451_v56 = vadd.f32 1.0, %v5308_v53 }
 0x703   : > { %v3454_v57 = vmul.f32 %v3450_v54, %v5825_v8  ;;  %v3467_v54 = vsel %vm288_vm2, %v232_v41, 0 }
 0x704   : > { %v5310_v59 = vpop.eup %5309  ;;  %v3455_v4 = vmul.f32 %v3451_v56, %v5828_v9 }
 0x705   : > { %v5312_v5 = vpop.eup %5311  ;;  %v3458_v19 = vadd.f32 %v5315_v11, %v3454_v57  ;;  %v3452_v23 = vadd.f32 1.0, %v5310_v59  ;;  %v233_v57 = vld [vmem:[#allocation6 + $0x58] sm:$0xff]  ;;  %v6261_v59 = vand.u32 4294901760, %v3467_v54 }
 0x706   : > { %v3453_v26 = vadd.f32 1.0, %v5312_v5  ;;  %v3459_v40 = vadd.f32 %v5316_v16, %v3455_v4  ;;  %v3470_v4 = vsel %vm288_vm2, %v233_v57, 0  ;;  %v234_v5 = vld [vmem:[#allocation6 + $0x60] sm:$0xff] }
 0x707   : > { %v3456_v42 = vmul.f32 %v3452_v23, %v5815_v63  ;;  %v3462_v43 = vmax.f32 %v3458_v19, 0.0  ;;  %v6265_v11 = vand.u32 4294901760, %v3470_v4  ;;  %v3473_v19 = vsel %vm288_vm2, %v234_v5, 0  ;;  %v235_v23 = vld [vmem:[#allocation6 + $0x68] sm:$0xff] }
 0x708   : > { %v3457_v48 = vmul.f32 %v3453_v26, %v5818_v2  ;;  %v3463_v51 = vmax.f32 %v3459_v40, 0.0  ;;  %v6271_v26 = vand.u32 4294901760, %v3473_v19  ;;  %v3476_v16 = vsel %vm288_vm2, %v235_v23, 0  ;;  %v236_v40 = vld [vmem:[#allocation6 + $0x70] sm:$0xff] }
 0x709   : > { %v3460_v55 = vadd.f32 %v5317_v52, %v3456_v42  ;;  %v3501_v8 = vand.u32 4294901760, %v3462_v43  ;;  %v6276_v42 = vand.u32 4294901760, %v3476_v16 }
 0x70a   : > { %v3461_v15 = vadd.f32 %v5318_v58, %v3457_v48  ;;  %v3499_v61 = vand.u32 4294901760, %v3463_v51  ;;  %v3479_v48 = vsel %vm288_vm2, %v236_v40, 0 }
 0x70b   : > { %v3464_v9 = vmax.f32 %v3460_v55, 0.0  ;;  %v3674_v62 = vsub.f32 %v3462_v43, %v3501_v8  ;;  %v6279_v43 = vsub.f32 %v3467_v54, %v6261_v59  ;;  %v6285_v55 = vand.u32 4294901760, %v3479_v48 }
 0x70c   : > { %v3465_v12 = vmax.f32 %v3461_v15, 0.0  ;;  %v3668_v3 = vsub.f32 %v3463_v51, %v3499_v61  ;;  %v237_v51 = vld [vmem:[#allocation6 + $0x78] sm:$0xff] }
 0x70d   : > { %v3494_v14 = vsel %vm268_vm0, %v3464_v9, 0  ;;  %v3675_v63 = vand.u32 4294901760, %v3674_v62  ;;  %v3570_v52 = vand.u32 4294901760, %v6279_v43  ;;  %v3482_v15 = vsel %vm288_vm2, %v237_v51, 0 }
 0x70e   : > { %v3497_v6 = vsel %vm268_vm0, %v3465_v12, 0  ;;  %v3505_v17 = vand.u32 4294901760, %v3494_v14  ;;  %v3669_v18 = vand.u32 4294901760, %v3668_v3  ;;  %v6297_v12 = vand.u32 4294901760, %v3482_v15 }
 0x70f   : > { %v3503_v7 = vand.u32 4294901760, %v3497_v6  ;;  %v3676_v29 = vsub.f32 %v3674_v62, %v3675_v63  ;;  %v3571_v58 = vsub.f32 %v6279_v43, %v3570_v52  ;;  %vm6598_vm0 = vcmask 121856  }
 0x710   : > { %v6250_v2 = vpack.c.bf16 %v3505_v17, %v3501_v8  ;;  %v3686_v24 = vsub.f32 %v3494_v14, %v3505_v17  ;;  %v3670_v33 = vsub.f32 %v3668_v3, %v3669_v18  ;;  %v6288_v8 = vsub.f32 %v3470_v4, %v6265_v11  ;;  %v239_v17 = vld [vmem:[#allocation6 + $0x88] sm:$0xff] }
 0x711   : > { %v6252_v28 = vpack.c.bf16 %v3503_v7, %v3499_v61  ;;  %v3680_v1 = vsub.f32 %v3497_v6, %v3503_v7  ;;  %v3677_v22 = vand.u32 4294901760, %v3676_v29  ;;  %v238_v61 = vld [vmem:[#allocation6 + $0x80] sm:$0xff]  ;;  %v3488_v29 = vsel %vm288_vm2, %v239_v17, 0 }
 0x712   : > { %v3687_v30 = vand.u32 4294901760, %v3686_v24  ;;  %v4944_v31 = vpack.c.bf16 %v3686_v24, %v3674_v62  ;;  %v3671_v49 = vand.u32 4294901760, %v3670_v33  ;;  %v3581_v9 = vand.u32 4294901760, %v6288_v8 }
 0x713   : > { %4935 = vmatprep.subr.bf16.mxu1 %v6252_v28  ;;  %v3681_v35 = vand.u32 4294901760, %v3680_v1  ;;  %v4942_v10 = vpack.c.bf16 %v3680_v1, %v3668_v3  ;;  %v3572_v62 = vand.u32 4294901760, %v3571_v58  ;;  %v6300_v3 = vsub.f32 %v3473_v19, %v6271_v26 }
 0x714   : > { %4937 = vmatpush1.bf16.msra.mxu1 %v6250_v2  ;;  %v3688_v36 = vsub.f32 %v3686_v24, %v3687_v30  ;;  %v6256_v0 = vpack.c.bf16 %v3687_v30, %v3675_v63  ;;  %v3582_v14 = vsub.f32 %v6288_v8, %v3581_v9  ;;  %v3485_v6 = vsel %vm288_vm2, %v238_v61, 0  ;;  %v240_v30 = vld [vmem:[#allocation6 + $0x90] sm:$0xff] }
 0x715   : > { %v3682_v38 = vsub.f32 %v3680_v1, %v3681_v35  ;;  %v6258_v21 = vpack.c.bf16 %v3681_v35, %v3669_v18  ;;  %v3592_v63 = vand.u32 4294901760, %v6300_v3  ;;  %v6310_v18 = vand.u32 4294901760, %v3485_v6 }
 0x716   : > { %v3689_v46 = vand.u32 4294901760, %v3688_v36  ;;  %v3583_v7 = vand.u32 4294901760, %v3582_v14  ;;  %v6313_v24 = vsub.f32 %v3476_v16, %v6276_v42  ;;  %v6323_v35 = vand.u32 4294901760, %v3488_v29 }
 0x717   : > { %v3683_v50 = vand.u32 4294901760, %v3682_v38  ;;  %3573 = vmatmul.mubr.f32.vlgmr.msra.gmra.mrb[20].mxu1 %v3572_v62  ;;  %v3593_v1 = vsub.f32 %v6300_v3, %v3592_v63  ;;  %v3491_v38 = vsel %vm288_vm2, %v240_v30, 0  ;;  %v5501_v62 = vmov 16  }
 0x718   : > { %v4940_v53 = vpack.c.bf16 %v3689_v46, %v3677_v22  ;;  %3578 = vmatprep.mubr.f32.mxu1 %v5486_v13  ;;  %v6336_v46 = vand.u32 4294901760, %v3491_v38  ;;  %v3646_v23 = vsub.f32 %v3488_v29, %v6323_v35  ;;  %5287 = vset.pattern.permute.xlu1 %v5501_v62  ;;  %v5502_v14 = vmov 15  }
 0x719   : > { %v4938_v56 = vpack.c.bf16 %v3683_v50, %v3671_v49  ;;  %v3594_v33 = vand.u32 4294901760, %v3593_v1  ;;  %v6339_v49 = vsub.f32 %v3482_v15, %v6297_v12  ;;  %5286 = vset.pattern.permute.xlu0 %v5502_v14  ;;  %4567 = vperm.xlu1 %5287, %v6166_v27   ;;  %vm6599_vm2 = vcmp.ge.s32.totalorder %v6104_v20, 16 }
 0x71a   : > { %v3647_v40 = vand.u32 4294901760, %v3646_v23  ;;  %4561 = vperm.xlu0 %5286, %v6166_v27  }
 0x71b   : > { %4939 = vmatprep.subr.bf16.mxu0 %v4938_v56  ;;  %3584 = vmatmul.mubr.f32.gmra.mrb[22].mxu1 %v3583_v7  ;;  %v6349_v56 = vsub.f32 %v3485_v6, %v6310_v18 }
 0x71c   : > { %4941 = vmatpush1.bf16.msra.mxu0 %v4940_v53  ;;  %3589 = vmatprep.mubr.f32.mxu1 %v5486_v13  ;;  %v3625_v53 = vand.u32 4294901760, %v6339_v49  ;;  %v3648_v51 = vsub.f32 %v3646_v23, %v3647_v40 }
 0x71d   : > { %4943 = vmatprep.subr.bf16.mxu0 %v4942_v10  ;;  %v6326_v10 = vsub.f32 %v3479_v48, %v6285_v55  ;;  %v3636_v4 = vand.u32 4294901760, %v6349_v56  ;;  %v3657_v48 = vsub.f32 %v3491_v38, %v6336_v46 }
 0x71e   : > { %v3626_v57 = vsub.f32 %v6339_v49, %v3625_v53  ;;  %v3649_v15 = vand.u32 4294901760, %v3648_v51  ;;  %5288 = vset.pattern.permute.xlu0 %v5501_v62 }
 0x71f   : > { %3753 = vmatmul.mubr.f32.vlgmr.msra.gmra.mrb[8].mxu0 %v6261_v59  ;;  %3595 = vmatmul.mubr.f32.gmra.mrb[24].mxu1 %v3594_v33  ;;  %v3614_v41 = vand.u32 4294901760, %v6326_v10  ;;  %v3637_v19 = vsub.f32 %v6349_v56, %v3636_v4  ;;  %v3658_v58 = vand.u32 4294901760, %v3657_v48 }
 0x720   : > { %4945 = vmatpush1.bf16.msra.mxu0 %v4944_v31  ;;  %3758 = vmatprep.mubr.f32.mxu0 %v5486_v13  ;;  %v3603_v31 = vand.u32 4294901760, %v6313_v24  ;;  %v3627_v5 = vand.u32 4294901760, %v3626_v57 }
 0x721   : > { %4947 = vmatprep.subr.bf16.mxu0 %v6252_v28  ;;  %3600 = vmatprep.mubr.f32.mxu1 %v5486_v13  ;;  %v3615_v50 = vsub.f32 %v6326_v10, %v3614_v41  ;;  %v3638_v16 = vand.u32 4294901760, %v3637_v19 }
 0x722   : > { %v3604_v36 = vsub.f32 %v6313_v24, %v3603_v31 }
 0x723   : > { %3760 = vmatmul.mubr.f32.gmra.mrb[10].mxu0 %v6265_v11  ;;  %v3616_v54 = vand.u32 4294901760, %v3615_v50 }
 0x724   : > { %3765 = vmatprep.mubr.f32.mxu0 %v5486_v13  ;;  %v3605_v22 = vand.u32 4294901760, %v3604_v36 }
 0x726   : > { %3606 = vmatmul.mubr.f32.gmra.mrb[26].mxu1 %v3605_v22 }
 0x727   : > { %3767 = vmatmul.mubr.f32.gmra.mrb[12].mxu0 %v6271_v26  ;;  %3611 = vmatprep.mubr.f32.mxu1 %v5486_v13 }
 0x728   : > { %3772 = vmatprep.mubr.f32.mxu0 %v5486_v13 }
 0x72a   : > { %3617 = vmatmul.mubr.f32.gmra.mrb[28].mxu1 %v3616_v54 }
 0x72b   : > { %3774 = vmatmul.mubr.f32.gmra.mrb[14].mxu0 %v6276_v42  ;;  %3622 = vmatprep.mubr.f32.mxu1 %v5486_v13 }
 0x72c   : > { %3779 = vmatprep.mubr.f32.mxu0 %v5486_v13 }
 0x72e   : > { %3628 = vmatmul.mubr.f32.gmra.mrb[30].mxu1 %v3627_v5 }
 0x72f   : > { %3781 = vmatmul.mubr.f32.gmra.mrb[16].mxu0 %v6285_v55  ;;  %3633 = vmatprep.mubr.f32.mxu1 %v5486_v13 }
 0x730   : > { %3786 = vmatprep.mubr.f32.mxu0 %v5486_v13 }
 0x732   : > { %3639 = vmatmul.mubr.f32.gmra.mrb[32].mxu1 %v3638_v16 }
 0x733   : > { %3788 = vmatmul.mubr.f32.gmra.mrb[18].mxu0 %v6297_v12  ;;  %3644 = vmatprep.mubr.f32.mxu1 %v5486_v13 }
 0x734   : > { %3793 = vmatprep.mubr.f32.mxu0 %v5486_v13 }
 0x736   : > { %3650 = vmatmul.mubr.f32.gmra.mrb[34].mxu1 %v3649_v15 }
 0x737   : > { %3795 = vmatmul.mubr.f32.gmra.mrb[20].mxu0 %v6310_v18  ;;  %3655 = vmatprep.mubr.f32.mxu1 %v5486_v13 }
 0x738   : > { %3800 = vmatprep.mubr.f32.mxu0 %v5486_v13 }
 0x73b   : > { %3802 = vmatmul.mubr.f32.gmra.mrb[22].mxu0 %v6323_v35 }
 0x73c   : > { %3807 = vmatprep.mubr.f32.mxu0 %v5486_v13 }
 0x73f   : > { %3809 = vmatmul.mubr.f32.gmra.mrb[24].mxu0 %v6336_v46 }
 0x740   : > { %3887 = vmatprep.mubr.f32.mxu0 %v5486_v13 }
 0x743   : > { %3890 = vmatmul.mubr.f32.vlgmr.msra.gmra.mrb[8].mxu0 %v6279_v43 }
 0x744   : > { %4949 = vmatpush1.bf16.msra.mxu0 %v6250_v2  ;;  %3895 = vmatprep.mubr.f32.mxu0 %v5486_v13 }
 0x745   : > { %4951 = vmatprep.subr.bf16.mxu0 %v6258_v21  ;;  %v3659_v21 = vsub.f32 %v3657_v48, %v3658_v58 }
 0x747   : > { %3898 = vmatmul.mubr.f32.gmra.mrb[10].mxu0 %v6288_v8  ;;  %v3660_v61 = vand.u32 4294901760, %v3659_v21 }
 0x748   : > { %3903 = vmatprep.mubr.f32.mxu0 %v5486_v13 }
 0x749   : > { %3661 = vmatmul.mubr.f32.gmra.mrb[36].mxu1 %v3660_v61 }
 0x74b   : > { %3906 = vmatmul.mubr.f32.gmra.mrb[12].mxu0 %v6300_v3 }
 0x74c   : > { %3911 = vmatprep.mubr.f32.mxu0 %v5486_v13 }
 0x74f   : > { %3914 = vmatmul.mubr.f32.gmra.mrb[14].mxu0 %v6313_v24 }
 0x750   : > { %3919 = vmatprep.mubr.f32.mxu0 %v5486_v13 }
 0x753   : > { %3922 = vmatmul.mubr.f32.gmra.mrb[16].mxu0 %v6326_v10 }
 0x754   : > { %3927 = vmatprep.mubr.f32.mxu0 %v5486_v13 }
 0x757   : > { %3930 = vmatmul.mubr.f32.gmra.mrb[18].mxu0 %v6339_v49 }
 0x758   : > { %3935 = vmatprep.mubr.f32.mxu0 %v5486_v13 }
 0x75b   : > { %3938 = vmatmul.mubr.f32.gmra.mrb[20].mxu0 %v6349_v56 }
 0x75c   : > { %3943 = vmatprep.mubr.f32.mxu0 %v5486_v13 }
 0x75f   : > { %3946 = vmatmul.mubr.f32.gmra.mrb[22].mxu0 %v3646_v23 }
 0x760   : > { %3951 = vmatprep.mubr.f32.mxu0 %v5486_v13 }
 0x763   : > { %3954 = vmatmul.mubr.f32.gmra.mrb[24].mxu0 %v3657_v48 }
 0x764   : > { %4028 = vmatprep.mubr.f32.mxu0 %v5486_v13 }
 0x767   : > { %4032 = vmatmul.mubr.f32.vlgmr.msra.gmra.mrb[8].mxu0 %v3570_v52 }
 0x768   : > { %4953 = vmatpush1.bf16.msra.mxu0 %v6256_v0  ;;  %4037 = vmatprep.mubr.f32.mxu0 %v5486_v13 }
 0x769   : > { %4955 = vmatprep.subr.bf16.mxu0 %v6252_v28 }
 0x76b   : > { %4041 = vmatmul.mubr.f32.gmra.mrb[10].mxu0 %v3581_v9 }
 0x76c   : > { %4046 = vmatprep.mubr.f32.mxu0 %v5486_v13 }
 0x76f   : > { %4050 = vmatmul.mubr.f32.gmra.mrb[12].mxu0 %v3592_v63 }
 0x770   : > { %4055 = vmatprep.mubr.f32.mxu0 %v5486_v13 }
 0x773   : > { %4059 = vmatmul.mubr.f32.gmra.mrb[14].mxu0 %v3603_v31 }
 0x774   : > { %4064 = vmatprep.mubr.f32.mxu0 %v5486_v13 }
 0x777   : > { %4068 = vmatmul.mubr.f32.gmra.mrb[16].mxu0 %v3614_v41 }
 0x778   : > { %4073 = vmatprep.mubr.f32.mxu0 %v5486_v13 }
 0x77b   : > { %4077 = vmatmul.mubr.f32.gmra.mrb[18].mxu0 %v3625_v53 }
 0x77c   : > { %4082 = vmatprep.mubr.f32.mxu0 %v5486_v13 }
 0x77f   : > { %4086 = vmatmul.mubr.f32.gmra.mrb[20].mxu0 %v3636_v4 }
 0x780   : > { %4091 = vmatprep.mubr.f32.mxu0 %v5486_v13 }
 0x783   : > { %4095 = vmatmul.mubr.f32.gmra.mrb[22].mxu0 %v3647_v40 }
 0x784   : > { %4100 = vmatprep.mubr.f32.mxu0 %v5486_v13 }
 0x787   : > { %4104 = vmatmul.mubr.f32.gmra.mrb[24].mxu0 %v3658_v58 }
 0x788   : > { %4186 = vmatprep.mubr.f32.mxu0 %v5486_v13 }
 0x78b   : > { %4188 = vmatmul.mubr.f32.vlgmr.msra.gmra.mrb[8].mxu0 %v6261_v59 }
 0x78c   : > { %4957 = vmatpush1.bf16.msra.mxu0 %v6250_v2  ;;  %4193 = vmatprep.mubr.f32.mxu0 %v5486_v13 }
 0x78f   : > { %4195 = vmatmul.mubr.f32.gmra.mrb[10].mxu0 %v6265_v11 }
 0x790   : > { %4200 = vmatprep.mubr.f32.mxu0 %v5486_v13 }
 0x793   : > { %4202 = vmatmul.mubr.f32.gmra.mrb[12].mxu0 %v6271_v26 }
 0x794   : > { %4207 = vmatprep.mubr.f32.mxu0 %v5486_v13 }
 0x797   : > { %4209 = vmatmul.mubr.f32.gmra.mrb[14].mxu0 %v6276_v42 }
 0x798   : > { %4214 = vmatprep.mubr.f32.mxu0 %v5486_v13 }
 0x79b   : > { %4216 = vmatmul.mubr.f32.gmra.mrb[16].mxu0 %v6285_v55 }
 0x79c   : > { %4221 = vmatprep.mubr.f32.mxu0 %v5486_v13 }
 0x79f   : > { %4223 = vmatmul.mubr.f32.gmra.mrb[18].mxu0 %v6297_v12 }
 0x7a0   : > { %4228 = vmatprep.mubr.f32.mxu0 %v5486_v13 }
 0x7a3   : > { %4230 = vmatmul.mubr.f32.gmra.mrb[20].mxu0 %v6310_v18 }
 0x7a4   : > { %4235 = vmatprep.mubr.f32.mxu0 %v5486_v13 }
 0x7a7   : > { %4237 = vmatmul.mubr.f32.gmra.mrb[22].mxu0 %v6323_v35 }
 0x7a8   : > { %4242 = vmatprep.mubr.f32.mxu0 %v5486_v13 }
 0x7ab   : > { %4244 = vmatmul.mubr.f32.gmra.mrb[24].mxu0 %v6336_v46 }
 0x7ac   : > { %4318 = vmatprep.mubr.f32.mxu0 %v5486_v13 }
 0x7af   : > { %4320 = vmatmul.mubr.f32.vlgmr.msra.gmra.mrb[8].mxu0 %v6261_v59 }
 0x7b0   : > { %4325 = vmatprep.mubr.f32.mxu0 %v5486_v13 }
 0x7b3   : > { %4327 = vmatmul.mubr.f32.gmra.mrb[10].mxu0 %v6265_v11 }
 0x7b4   : > { %4332 = vmatprep.mubr.f32.mxu0 %v5486_v13 }
 0x7b7   : > { %4334 = vmatmul.mubr.f32.gmra.mrb[12].mxu0 %v6271_v26 }
 0x7b8   : > { %4339 = vmatprep.mubr.f32.mxu0 %v5486_v13 }
 0x7bb   : > { %4341 = vmatmul.mubr.f32.gmra.mrb[14].mxu0 %v6276_v42 }
 0x7bc   : > { %4346 = vmatprep.mubr.f32.mxu0 %v5486_v13 }
 0x7bf   : > { %4348 = vmatmul.mubr.f32.gmra.mrb[16].mxu0 %v6285_v55 }
 0x7c0   : > { %4353 = vmatprep.mubr.f32.mxu0 %v5486_v13 }
 0x7c3   : > { %4355 = vmatmul.mubr.f32.gmra.mrb[18].mxu0 %v6297_v12 }
 0x7c4   : > { %4360 = vmatprep.mubr.f32.mxu0 %v5486_v13 }
 0x7c7   : > { %4362 = vmatmul.mubr.f32.gmra.mrb[20].mxu0 %v6310_v18 }
 0x7c8   : > { %4367 = vmatprep.mubr.f32.mxu0 %v5486_v13 }
 0x7cb   : > { %4369 = vmatmul.mubr.f32.gmra.mrb[22].mxu0 %v6323_v35 }
 0x7cc   : > { %4374 = vmatprep.mubr.f32.mxu0 %v5486_v13 }
 0x7cf   : > { %4376 = vmatmul.mubr.f32.gmra.mrb[24].mxu0 %v6336_v46 }
 0x7ea   : > { %v3574_v27 = vpop.f32.mrb[20].mxu1 }
 0x7eb   : > { %v3576_v2 = vpop.f32.mrb[21].mxu1 }
 0x7ee   : > { %v3585_v28 = vpop.f32.mrb[22].mxu1 }
 0x7ef   : > { %v3587_v0 = vpop.f32.mrb[23].mxu1 }
 0x7f2   : > { %v3596_v59 = vpop.f32.mrb[24].mxu1 }
 0x7f3   : > { %v3598_v11 = vpop.f32.mrb[25].mxu1 }
 0x7f9   : > { %v3607_v26 = vpop.f32.mrb[26].mxu1 }
 0x7fa   : > { %v3609_v42 = vpop.f32.mrb[27].mxu1 }
 0x7fd   : > { %v3618_v43 = vpop.f32.mrb[28].mxu1 }
 0x7fe   : > { %v3620_v52 = vpop.f32.mrb[29].mxu1 }
 0x801   : > { %v3629_v55 = vpop.f32.mrb[30].mxu1 }
 0x802   : > { %v3631_v8 = vpop.f32.mrb[31].mxu1 }
 0x805   : > { %v3640_v9 = vpop.f32.mrb[32].mxu1 }
 0x806   : > { %v3642_v12 = vpop.f32.mrb[33].mxu1 }
 0x809   : > { %v3651_v3 = vpop.f32.mrb[34].mxu1 }
 0x80a   : > { %v3653_v6 = vpop.f32.mrb[35].mxu1 }
 0x81c   : > { %v3662_v17 = vpop.f32.mrb[36].mxu1 }
 0x81d   : > { %v3664_v13 = vpop.f32.mrb[37].mxu1 }
 0x882   : > { %v4321_v63 = vpop.f32.mrb[8].mxu0 }
 0x883   : > { %v4962_v7 = vadd.f32 %v4321_v63, %v3574_v27  ;;  %v4323_v18 = vpop.f32.mrb[9].mxu0  ;;  %v4542_v27 = vld [vmem:[#allocation2 + $0x118] sm:$0xff] }
 0x884   : > { %v4963_v24 = vadd.f32 %v4323_v18, %v3576_v2  ;;  %v4427_v2 = vpop.permute.xlu1 %4426 }
 0x885   : > { %4408 = vrot.lane.b32.xlu1 %v4962_v7, %s5491_s24 }
 0x886   : > { %v4328_v1 = vpop.f32.mrb[10].mxu0  ;;  %4410 = vrot.lane.b32.xlu0 %v4963_v24, %s5491_s24  ;;  %s5409_s24 = sshll.u32 %s5503_s16, 4  ;;  %s5410_s24 = int_to_ptr.vmem [resolvable:$false] %s5409_s24 }
 0x887   : > { %v4964_v29 = vadd.f32 %v4328_v1, %v3585_v28  ;;  %v4330_v30 = vpop.f32.mrb[11].mxu0  ;;  %p5412_p7 = scmp.lt.s32.totalorder %s6518_s22, %s5410_s24 }
 0x888   : > { %v4965_v31 = vadd.f32 %v4330_v30, %v3587_v0  ;;  %v4467_v28 = vpop.permute.xlu1 %4466  ;;  %v4407_v0 = vpop.permute.xlu0 %4406 }
 0x88a   : > { %v4335_v33 = vpop.f32.mrb[12].mxu0  ;;  %4428 = vrot.lane.b32.xlu0 %v4964_v29, %s5492_s26  ;;  %4430 = vrot.lane.b32.xlu1 %v4965_v31, %s5492_s26  ;;  %s5411_s26 = scalar_lea.vmem %s5410_s24, 512 }
 0x88b   : > { %v4966_v35 = vadd.f32 %v4335_v33, %v3596_v59  ;;  %v4337_v10 = vpop.f32.mrb[13].mxu0  ;;  %p5413_p9 = scmp.lt.s32.totalorder %s5411_s26, %s5405_s17 }
 0x88c   : > { %v4967_v36 = vadd.f32 %v4337_v10, %v3598_v11  ;;  %v4511_v59 = vpop.permute.xlu1 %4510  ;;  %v4447_v11 = vpop.permute.xlu0 %4446 }
 0x88d   : > { %p5414_p12 = por %p5413_p9, %p5412_p7 }
 0x88e   : > { %v4342_v38 = vpop.f32.mrb[14].mxu0  ;;  %4448 = vrot.lane.b32.xlu1 %v4966_v35, %s5494_s27  ;;  %4450 = vrot.lane.b32.xlu0 %v4967_v36, %s5494_s27 }
 0x88f   : > { %v4968_v41 = vadd.f32 %v4342_v38, %v3607_v26  ;;  %v4344_v22 = vpop.f32.mrb[15].mxu0  ;;  %p5415_p2 = pnand %p5414_p12, %p5408_p3 }
 0x890   : > { %v4969_v46 = vadd.f32 %v4344_v22, %v3609_v42  ;;  %v4531_v26 = vpop.permute.xlu1 %4530  ;;  %v4491_v42 = vpop.permute.xlu0 %4490 }
 0x892   : > { %v4349_v49 = vpop.f32.mrb[16].mxu0  ;;  %4468 = vrot.lane.b32.xlu0 %v4968_v41, %s5495_s23  ;;  %4470 = vrot.lane.b32.xlu1 %v4969_v46, %s5495_s23 }
 0x893   : > { %v4970_v50 = vadd.f32 %v4349_v49, %v3618_v43  ;;  %v4351_v53 = vpop.f32.mrb[17].mxu0 }
 0x894   : > { %v4971_v54 = vadd.f32 %v4351_v53, %v3620_v52  ;;  %v6459_v43 = vpop.permute.xlu1 %4567  ;;  %v6461_v52 = vpop.permute.xlu0 %4561 }
 0x896   : > { %v4356_v56 = vpop.f32.mrb[18].mxu0 }
 0x897   : > { %v4972_v57 = vadd.f32 %v4356_v56, %v3629_v55  ;;  %v4358_v4 = vpop.f32.mrb[19].mxu0 }
 0x898   : > { %v4973_v5 = vadd.f32 %v4358_v4, %v3631_v8 }
 0x899   : > { %4486 = vrot.lane.b32.xlu0 %v4972_v57, %s5497_s10 }
 0x89a   : > { %v4363_v19 = vpop.f32.mrb[20].mxu0  ;;  %4488 = vrot.lane.b32.xlu1 %v4973_v5, %s5497_s10 }
 0x89b   : > { %v4974_v23 = vadd.f32 %v4363_v19, %v3640_v9  ;;  %v4365_v16 = vpop.f32.mrb[21].mxu0 }
 0x89c   : > { %v4975_v40 = vadd.f32 %v4365_v16, %v3642_v12 }
 0x89e   : > { %v4370_v48 = vpop.f32.mrb[22].mxu0  ;;  %4506 = vrot.lane.b32.xlu1 %v4974_v23, %s5496_s5  ;;  %4508 = vrot.lane.b32.xlu0 %v4975_v40, %s5496_s5 }
 0x89f   : > { %v4976_v51 = vadd.f32 %v4370_v48, %v3651_v3  ;;  %v4372_v58 = vpop.f32.mrb[23].mxu0 }
 0x8a0   : > { %v4977_v15 = vadd.f32 %v4372_v58, %v3653_v6 }
 0x8a2   : > { %v4377_v21 = vpop.f32.mrb[24].mxu0  ;;  %4526 = vrot.lane.b32.xlu0 %v4976_v51, %s5498_s11  ;;  %4528 = vrot.lane.b32.xlu1 %v4977_v15, %s5498_s11 }
 0x8a3   : > { %v4978_v61 = vadd.f32 %v4377_v21, %v3662_v17  ;;  %v4379_v62 = vpop.f32.mrb[25].mxu0 }
 0x8a4   : > { %v4979_v14 = vadd.f32 %v4379_v62, %v3664_v13 }
 0x8a6   : > { %4546 = vrot.lane.b32.xlu0 %v4978_v61, %s5500_s25  ;;  %4548 = vrot.lane.b32.xlu1 %v4979_v14, %s5500_s25 }
 0x8aa   : > { %4550 = vrot.lane.b32.xlu0 %v4542_v27, %s5500_s25 }
 0x8f7   : > { %v4409_v55 = vpop.permute.xlu1 %4408 }
 0x8f8   : > { %v4411_v8 = vpop.permute.xlu0 %4410  ;;  %v4412_v17 = vsel %vm2705_vm7, %v4407_v0, %v4409_v55 }
 0x8f9   : > { %v4416_v7 = vsel %vm6125_vm10, %v4412_v17, 0.0  ;;  %v4413_v24 = vsel %vm2705_vm7, %v4409_v55, %v4411_v8  ;;  %vm6601_vm7 = vmmov %vm6598_vm0  ;;  %vm6602_vm10 = vcmask 924672  }
 0x8fa   : > { %v4418_v30 = vadd.f32 %v4970_v50, %v4416_v7  ;;  %v4417_v35 = vsel %vm6116_vm8, %v4413_v24, 0.0 }
 0x8fb   : > { %v4419_v22 = vadd.f32 %v4971_v54, %v4417_v35 }
 0x8fc   : > { %v4431_v9 = vpop.permute.xlu1 %4430  ;;  %v4429_v12 = vpop.permute.xlu0 %4428 }
 0x8fd   : > { %v4432_v13 = vsel %vm2730_vm9, %v4427_v2, %v4429_v12  ;;  %v4433_v49 = vsel %vm2730_vm9, %v4429_v12, %v4431_v9  ;;  %vm6603_vm9 = vmmov %vm6602_vm10 }
 0x8fe   : > { %v4436_v29 = vsel %vm6599_vm2, %v4432_v13, 0.0  ;;  %v4439_v19 = vadd.f32 %v4433_v49, %v4419_v22 }
 0x8ff   : > { %v4438_v36 = vadd.f32 %v4436_v29, %v4418_v30 }
 0x900   : > { %v4451_v3 = vpop.permute.xlu0 %4450  ;;  %v4449_v6 = vpop.permute.xlu1 %4448 }
 0x901   : > { %v4452_v1 = vsel %vm6598_vm0, %v4447_v11, %v4449_v6  ;;  %v4453_v46 = vsel %vm6601_vm7, %v4449_v6, %v4451_v3 }
 0x902   : > { %v4456_v10 = vsel %vm6143_vm14, %v4452_v1, 0.0  ;;  %v4457_v5 = vsel %vm6148_vm15, %v4453_v46, 0.0 }
 0x903   : > { %v4458_v20 = vadd.f32 %v4456_v10, %v4438_v36  ;;  %v4459_v58 = vadd.f32 %v4457_v5, %v4439_v19 }
 0x904   : > { %v4469_v63 = vpop.permute.xlu0 %4468  ;;  %v4471_v18 = vpop.permute.xlu1 %4470 }
 0x905   : > { %v4472_v31 = vsel %vm6600_vm6, %v4467_v28, %v4469_v63  ;;  %v4473_v44 = vsel %vm6600_vm6, %v4469_v63, %v4471_v18 }
 0x906   : > { %v4476_v41 = vsel %vm6111_vm5, %v4472_v31, 0.0  ;;  %v4477_v40 = vsel %vm6116_vm8, %v4473_v44, 0.0 }
 0x907   : > { %v4478_v57 = vadd.f32 %v4476_v41, %v4458_v20  ;;  %v4479_v32 = vadd.f32 %v4477_v40, %v4459_v58 }
 0x90b   : > { %v4487_v33 = vpop.permute.xlu0 %4486 }
 0x90c   : > { %v4489_v37 = vpop.permute.xlu1 %4488 }
 0x90d   : > { %v4492_v38 = vsel %vm2805_vm1, %v4487_v33, %v4489_v37  ;;  %v4493_v23 = vsel %vm2805_vm1, %v4489_v37, %v4491_v42 }
 0x90e   : > { %v4496_v50 = vsel %vm6130_vm11, %v4492_v38, 0.0  ;;  %v4497_v61 = vsel %vm6148_vm15, %v4493_v23, 0.0 }
 0x90f   : > { %v4498_v16 = vadd.f32 %v4496_v50, %v4478_v57  ;;  %v4499_v28 = vadd.f32 %v4497_v61, %v4479_v32 }
 0x910   : > { %v4507_v53 = vpop.permute.xlu1 %4506  ;;  %v4509_v56 = vpop.permute.xlu0 %4508 }
 0x911   : > { %v4512_v4 = vsel %vm6602_vm10, %v4507_v53, %v4509_v56  ;;  %v4513_v15 = vsel %vm6603_vm9, %v4509_v56, %v4511_v59 }
 0x912   : > { %v4516_v54 = vsel %vm6111_vm5, %v4512_v4, 0.0  ;;  %v4517_v27 = vsel %vm6182_vm12, %v4513_v15, 0.0  ;;  %vm6604_vm5 = vcmp.lt.s32.totalorder %v6107_v25, 240 }
 0x913   : > { %v4518_v21 = vadd.f32 %v4516_v54, %v4498_v16  ;;  %v4519_v42 = vadd.f32 %v4517_v27, %v4499_v28 }
 0x914   : > { %v4529_v48 = vpop.permute.xlu1 %4528  ;;  %v4527_v51 = vpop.permute.xlu0 %4526 }
 0x915   : > { %v4532_v62 = vsel %vm2855_vm13, %v4527_v51, %v4529_v48  ;;  %v4533_v14 = vsel %vm2855_vm13, %v4529_v48, %v4531_v26 }
 0x916   : > { %v4538_v0 = vadd.f32 %v4532_v62, %v4518_v21  ;;  %v4537_v47 = vsel %vm6604_vm5, %v4533_v14, 0.0 }
 0x917   : > { %v4539_v26 = vadd.f32 %v4537_v47, %v4519_v42 }
 0x918   : > { %v4549_v34 = vpop.permute.xlu1 %4548  ;;  %v4547_v2 = vpop.permute.xlu0 %4546 }
 0x919   : > { %v4552_v59 = vsel %vm2880_vm4, %v4547_v2, %v4549_v34 }
 0x91a   : > { %v4556_v11 = vsel %vm6130_vm11, %v4552_v59, 0.0 }
 0x91b   : > { %v4558_v55 = vadd.f32 %v4556_v11, %v4538_v0 }
 0x91c   : > { %v4551_v8 = vpop.permute.xlu0 %4550 }
 0x91d   : > { %v4564_v60 = vmul.f32 %v6461_v52, %v4558_v55  ;;  %v4553_v9 = vsel %vm2880_vm4, %v4549_v34, %v4551_v8 }
 0x91e   : > { %v4557_v12 = vsel %vm6209_vm3, %v4553_v9, 0.0 }
 0x91f   : > { %v4570_v3 = vadd.f32 %v6459_v43, %v4564_v60  ;;  %v4559_v25 = vadd.f32 %v4557_v12, %v4539_v26 }
 0x921   : > { %v4572_v6 = vmax.f32 %v4570_v3, 0.0  ;;  %v4565_v39 = vmul.f32 %v6461_v52, %v4559_v25 }
 0x923   : > { %v4571_v17 = vadd.f32 %v6459_v43, %v4565_v39  ;;  %4574 = vst [vmem:[%s217_s21] sm:$0xff] %v4572_v6 }
 0x925   : > { %v4573_v13 = vmax.f32 %v4571_v17, 0.0 }
 0x927   : > { %4575 = vst [vmem:[%s217_s21 + $0x8] sm:$0xff] %v4573_v13 }
 0x928   : > { %5418 = shalt.err (!%p5415_p2)
}
 0x929   : > { %s5419_s28 = scalar_lea.hbm %s6516_s18, 256  ;;  %s5423_s5 = scalar_lea.hbm %s6563_s3, 512 }
 0x92a   : > { %p5420_p13 = scmp.ne.s32.totalorder %s6516_s18, %s5419_s28  ;;  %p5424_p4 = scmp.lt.u32.totalorder %s6516_s18, %s6563_s3 }
 0x92b   : > { %p5425_p5 = scmp.lt.u32.totalorder %s5423_s5, %s5419_s28  ;;  %p5427_p11 = scmp.lt.u32.totalorder %s5419_s28, %s6516_s18 }
 0x92c   : > { %p5421_p6 = pnand %p5420_p13, %p6605_p0 }
 0x92d   : > { %p5426_p8 = por %p5425_p5, %p5424_p4 }
 0x92e   : > { %p5422_p10 = pneg %p5421_p6 }
 0x92f   : > { %p5428_p1 = por %p5427_p11, %p5426_p8 }
 0x931   : > { %p5429_p3 = pnand %p5428_p1, %p5422_p10 }
 0x933   : > { %5432 = shalt.err (!%p5429_p3)
}
 0x934   : > { %5202 = dma.vmem_to_hbm [thread:$0]  (%p6605_p0), %s6518_s22, 256, %s6516_s18, %s4577_s20  }
 0x935 PF: > { %s4603_s25 = sand.u32 1, %s5463_s12   ;;  %p6606_p7 = scmp.ne.s32.totalorder %s6573_s19, 0 }
 0x936   : > { %p6607_p9 = scmp.ge.s32.totalorder %s5475_s15, 2  ;;  %s4604_s7 = scalar_lea.sflag [#allocation5], %s4603_s25 }
 0x938   : > { %p5216_p12 = pnand %p6607_p9, %p6606_p7 }
 0x93a   : > { %5458 = dma.done.wait (!%p5216_p12), %s4604_s7, 256  }
 0x93b   : > { %5460 = vsyncadd (!%p5216_p12), %s4604_s7, 4294967040  ;;  %p17_p2 = scmp.ge.s32.totalorder %s5634_s4, 4   ;;  %s6608_s12 = smov %s5467_s13 }
 0x93c   : > { %s6609_s13 = smov %s5471_s14  ;;  %s6610_s14 = smov %s5650_s9 }
 0x93d   : > { %s6611_s15 = smov %s5634_s4  ;;  %19 = sbr.rel (!%p17_p2) target bundleno = 6 (0x6), region = 85 }
 0x944   :  { %4609 = vsyncpa [#allocation4], 1 }
 0x945   :  { %4611 = vsyncpa [#allocation4 + $0x1], 1 }
 0x946   :  { %4612 = vsyncpa [#allocation7], 1 }
 0x947   :  { %4613 = vsyncpa [#allocation5], 1 }
 0x948   :  { %4615 = vsyncpa [#allocation5 + $0x1], 1 }

</bundles_post_ra>
